<compile_context>
chip_gen: v7x
topology: tpu7x:2x2x1
jax: 0.10.0
libtpu: 0.0.40
codegen_flags: <defaults>
</compile_context>

<pallas_src>
import functools

import jax
import jax.numpy as jnp
from jax.experimental import pallas as pl
from jax.experimental.pallas import tpu as pltpu


# --------------------------------------------------------------------------
# Helpers
# --------------------------------------------------------------------------
def _round_up(v, m):
    return ((v + m - 1) // m) * m


def _pick_tm(M):
    m8 = _round_up(M, 8)
    return m8 if m8 <= 512 else 512


def _apply_act(y, act):
    if act == "relu":
        return jnp.maximum(y, 0.0)
    if act == "sigmoid":
        return jax.nn.sigmoid(y)
    return y


def _run_layers(y, layer_refs, offset, acts):
    """y <- act_l(y @ W_l + shift_l) for each layer starting at ref offset."""
    for l, act in enumerate(acts):
        w = layer_refs[offset + 2 * l][...]          # bf16 (K_l, N_l)
        t = layer_refs[offset + 2 * l + 1][...]      # f32  (1,  N_l)
        y = jnp.dot(y.astype(jnp.bfloat16), w,
                    preferred_element_type=jnp.float32) + t
        y = _apply_act(y, act)
    return y


def _l2_normalize_groups(y, groups):
    """F.normalize(p=2) per column group: y / max(||y||_grp, 1e-12)."""
    col = jax.lax.broadcasted_iota(jnp.int32, y.shape, dimension=1)
    inv_all = jnp.zeros_like(y)
    for (a, b) in groups:
        mask = (col >= a) & (col < b)
        ss = jnp.sum(jnp.where(mask, y * y, 0.0), axis=-1, keepdims=True)
        inv = jax.lax.rsqrt(jnp.maximum(ss, 1e-24))   # EUP rsqrt
        inv_all = jnp.where(mask, inv, inv_all)
    return y * inv_all


# --------------------------------------------------------------------------
# Pallas kernel 1: fused chain of matmuls + folded-BN shift + activation.
# Refs: (x, w0, t0, w1, t1, ..., out)
# --------------------------------------------------------------------------
def _chain_kernel(*refs, acts):
    x_ref = refs[0]
    o_ref = refs[-1]
    layer_refs = refs[1:-1]
    y = _run_layers(x_ref[...], layer_refs, 0, acts)
    o_ref[...] = y.astype(o_ref.dtype)


def fused_chain(x2, layers, acts, *, out_dtype=jnp.float32):
    """y = chain of act_l(y @ W_l + shift_l); x2:(M,K0), layers:[(W,shift)]."""
    M, K0 = x2.shape
    TM = _pick_tm(M)
    Mp = _round_up(M, TM)
    if Mp != M:
        x2 = jnp.pad(x2, ((0, Mp - M), (0, 0)))
    x2 = x2.astype(jnp.bfloat16)

    in_arrays = [x2]
    in_specs = [pl.BlockSpec((TM, K0), lambda i: (i, 0))]
    for (w2, t) in layers:
        K, N = w2.shape
        in_arrays.append(w2.astype(jnp.bfloat16))
        in_specs.append(pl.BlockSpec((K, N), lambda i: (0, 0)))
        in_arrays.append(t.reshape(1, N).astype(jnp.float32))
        in_specs.append(pl.BlockSpec((1, N), lambda i: (0, 0)))
    N_last = layers[-1][0].shape[1]

    kernel = functools.partial(_chain_kernel, acts=tuple(acts))
    out = pl.pallas_call(
        kernel,
        out_shape=jax.ShapeDtypeStruct((Mp, N_last), out_dtype),
        grid_spec=pltpu.PrefetchScalarGridSpec(
            num_scalar_prefetch=0,
            grid=(Mp // TM,),
            in_specs=in_specs,
            out_specs=pl.BlockSpec((TM, N_last), lambda i: (i, 0)),
        ),
        compiler_params=pltpu.CompilerParams(
            dimension_semantics=("parallel",)),
    )(*in_arrays)
    return out[:M]


# --------------------------------------------------------------------------
# Pallas kernel 2: weightedSH conv + both ind heads + both regress heads,
# fully fused.  The weightedSH activation lives only in vregs and feeds all
# four heads.  Output columns: [p1, p2, dir1(3), dir2(3)] -> (TM, 8).
# Refs: (x, wsh_w, wsh_t, ind_w0, ind_t0, ..., reg_w0, reg_t0, ..., out)
# --------------------------------------------------------------------------
def _heads_kernel(*refs, n_ind, ind_acts, reg_acts, norm_groups):
    x_ref = refs[0]
    o_ref = refs[-1]
    layer_refs = refs[1:-1]

    # weightedSH (k=3 conv folded) + BN, no activation.
    base = _run_layers(x_ref[...], layer_refs, 0, ("none",))

    # Twin ind heads (block-diagonal stacked): relu, relu, sigmoid -> (TM, 2)
    ind = _run_layers(base, layer_refs, 2, ind_acts)

    # Twin regress heads (block-diagonal stacked): 5x relu + linear -> (TM, 6)
    reg = _run_layers(base, layer_refs, 2 + 2 * n_ind, reg_acts)
    # F.normalize(dim=channels) per head, fused in-kernel.
    reg = _l2_normalize_groups(reg, norm_groups)

    o_ref[...] = jnp.concatenate([ind, reg], axis=1).astype(o_ref.dtype)


def fused_heads(x2, sh_layer, ind_layers, reg_layers, *,
                out_dtype=jnp.float32):
    M, K0 = x2.shape
    TM = _pick_tm(M)
    Mp = _round_up(M, TM)
    if Mp != M:
        x2 = jnp.pad(x2, ((0, Mp - M), (0, 0)))
    x2 = x2.astype(jnp.bfloat16)

    in_arrays = [x2]
    in_specs = [pl.BlockSpec((TM, K0), lambda i: (i, 0))]

    def add_layer(w2, t):
        K, N = w2.shape
        in_arrays.append(w2.astype(jnp.bfloat16))
        in_specs.append(pl.BlockSpec((K, N), lambda i: (0, 0)))
        in_arrays.append(t.reshape(1, N).astype(jnp.float32))
        in_specs.append(pl.BlockSpec((1, N), lambda i: (0, 0)))

    add_layer(*sh_layer)
    for (w, t) in ind_layers:
        add_layer(w, t)
    for (w, t) in reg_layers:
        add_layer(w, t)

    n_ind_out = ind_layers[-1][0].shape[1]   # 2
    n_reg_out = reg_layers[-1][0].shape[1]   # 6
    N_out = n_ind_out + n_reg_out            # 8

    kernel = functools.partial(
        _heads_kernel,
        n_ind=len(ind_layers),
        ind_acts=("relu", "relu", "sigmoid"),
        reg_acts=("relu",) * 5 + ("none",),
        norm_groups=((0, 3), (3, 6)),
    )
    out = pl.pallas_call(
        kernel,
        out_shape=jax.ShapeDtypeStruct((Mp, N_out), out_dtype),
        grid_spec=pltpu.PrefetchScalarGridSpec(
            num_scalar_prefetch=0,
            grid=(Mp // TM,),
            in_specs=in_specs,
            out_specs=pl.BlockSpec((TM, N_out), lambda i: (i, 0)),
        ),
        compiler_params=pltpu.CompilerParams(
            dimension_semantics=("parallel",)),
    )(*in_arrays)
    return out[:M]


# --------------------------------------------------------------------------
# Glue: im2col for k=3 valid conv, BN/bias folding, twin-head stacking
# --------------------------------------------------------------------------
def im2col3(x, k):
    """x: (N, D, H, W, Cin) channels-last -> ((M, k^3*Cin), out spatial)."""
    Nb, D, H, W, Cin = x.shape
    Do, Ho, Wo = D - k + 1, H - k + 1, W - k + 1
    cols = []
    for kd in range(k):
        for kh in range(k):
            for kw in range(k):
                cols.append(x[:, kd:kd + Do, kh:kh + Ho, kw:kw + Wo, :])
    x2 = jnp.concatenate(cols, axis=-1).reshape(-1, k * k * k * Cin)
    return x2, (Nb, Do, Ho, Wo)


def fold_conv(params, k):
    """Fold conv bias + eval-mode BN into (W2 (K,N), shift (N,))."""
    w = params["w"]                       # (Cout, Cin, k, k, k)  PyTorch layout
    b = params["b"]
    Cout, Cin = w.shape[0], w.shape[1]
    if k == 1:
        w2 = w.reshape(Cout, Cin).T
    else:
        w2 = jnp.transpose(w, (2, 3, 4, 1, 0)).reshape(k * k * k * Cin, Cout)
    if "gamma" in params:
        s = params["gamma"] / jnp.sqrt(params["var"] + 1e-5)
        w2 = w2 * s[None, :]              # fold BN scale into weights
        shift = s * b + params["beta"] - s * params["mean"]
    else:
        shift = b
    return w2, shift


def _block_diag(a, b):
    Ka, Na = a.shape
    Kb, Nb = b.shape
    top = jnp.concatenate([a, jnp.zeros((Ka, Nb), a.dtype)], axis=1)
    bot = jnp.concatenate([jnp.zeros((Kb, Na), b.dtype), b], axis=1)
    return jnp.concatenate([top, bot], axis=0)


def combine_heads(head_a, head_b):
    """Stack the twin dir1/dir2 heads along output channels (block-diag)."""
    layers = []
    for li, (pa, pb) in enumerate(zip(head_a, head_b)):
        wa, ta = fold_conv(pa, 1)
        wb, tb = fold_conv(pb, 1)
        if li == 0:
            w = jnp.concatenate([wa, wb], axis=1)   # shared input features
        else:
            w = _block_diag(wa, wb)
        t = jnp.concatenate([ta, tb], axis=0)
        layers.append((w, t))
    return layers


# --------------------------------------------------------------------------
# Deterministic parameter construction (synthetic weights, PyTorch shapes)
# --------------------------------------------------------------------------
def make_conv_params(key, cin, cout, k, bn=True):
    ks = jax.random.split(key, 6)
    p = {
        "w": 0.05 * jax.random.normal(ks[0], (cout, cin, k, k, k), jnp.float32),
        "b": 0.05 * jax.random.normal(ks[1], (cout,), jnp.float32),
    }
    if bn:
        p["gamma"] = 1.0 + 0.1 * jax.random.normal(ks[2], (cout,), jnp.float32)
        p["beta"] = 0.1 * jax.random.normal(ks[3], (cout,), jnp.float32)
        p["mean"] = 0.1 * jax.random.normal(ks[4], (cout,), jnp.float32)
        p["var"] = jax.random.uniform(ks[5], (cout,), jnp.float32, 0.5, 1.5)
    return p


def init_params(key, in_channels, c1, out_channels):
    keys = iter(jax.random.split(key, 64))
    P = {}
    P["conv"] = [
        make_conv_params(next(keys), in_channels, c1, 3),
        make_conv_params(next(keys), c1, c1 // 2, 3),
        make_conv_params(next(keys), c1 // 2, c1 // 2, 1),
        make_conv_params(next(keys), c1 // 2, c1 // 4, 1),
        make_conv_params(next(keys), c1 // 4, c1 // 2, 1),
        make_conv_params(next(keys), c1 // 2, out_channels, 1),
    ]
    P["weightedSH"] = [make_conv_params(next(keys), out_channels, out_channels, 3)]

    def ind_params():
        return [
            make_conv_params(next(keys), out_channels, c1 // 2, 1),
            make_conv_params(next(keys), c1 // 2, c1 // 2, 1),
            make_conv_params(next(keys), c1 // 2, 1, 1, bn=False),
        ]

    def reg_params():
        return [
            make_conv_params(next(keys), out_channels, c1 // 8, 1, bn=False),
            make_conv_params(next(keys), c1 // 8, c1 // 4, 1, bn=False),
            make_conv_params(next(keys), c1 // 4, c1 // 2, 1, bn=False),
            make_conv_params(next(keys), c1 // 2, c1 // 4, 1, bn=False),
            make_conv_params(next(keys), c1 // 4, c1 // 8, 1, bn=False),
            make_conv_params(next(keys), c1 // 8, 3, 1, bn=False),
        ]

    P["dir1ind"] = ind_params()
    P["dir2ind"] = ind_params()
    P["dir1regress"] = reg_params()
    P["dir2regress"] = reg_params()
    return P


# --------------------------------------------------------------------------
# Forward pass (mirrors DirPatchWeightNet.forward) — 3 pallas_calls total
# --------------------------------------------------------------------------
def forward(params, x):
    """x: (N, D, H, W, Cin) channels-last; returns NCDHW tensors like PyTorch."""
    p = params

    # call 1: conv1 (k=3) + BN + ReLU            -> bf16 intermediate to HBM
    x2, (Nb, D1, H1, W1) = im2col3(x, 3)
    h = fused_chain(x2, [fold_conv(p["conv"][0], 3)], ["relu"],
                    out_dtype=jnp.bfloat16)
    h = h.reshape(Nb, D1, H1, W1, -1)

    # call 2: conv2 (k=3) + BN + ReLU + whole 1x1 trunk chain, fully fused.
    x2, (Nb, D2, H2, W2) = im2col3(h, 3)
    trunk_layers = ([fold_conv(p["conv"][1], 3)]
                    + [fold_conv(p["conv"][i], 1) for i in range(2, 6)])
    odf_flat = fused_chain(x2, trunk_layers,
                           ["relu", "relu", "relu", "relu", "none"],
                           out_dtype=jnp.float32)
    odf_sh = odf_flat.reshape(Nb, D2, H2, W2, -1)

    # call 3: weightedSH (k=3) + BN + both ind heads + both regress heads
    #         + per-head F.normalize, all fused.  The weightedSH activation
    #         never leaves VMEM/vregs.
    x2, (Nb, D3, H3, W3) = im2col3(odf_sh, 3)
    sh_layer = fold_conv(p["weightedSH"][0], 3)
    ind_layers = combine_heads(p["dir1ind"], p["dir2ind"])
    reg_layers = combine_heads(p["dir1regress"], p["dir2regress"])
    heads = fused_heads(x2, sh_layer, ind_layers, reg_layers,
                        out_dtype=jnp.float32)

    p1 = heads[:, 0:1].reshape(Nb, D3, H3, W3, 1)
    p2 = heads[:, 1:2].reshape(Nb, D3, H3, W3, 1)
    dir1 = heads[:, 2:5].reshape(Nb, D3, H3, W3, 3)
    dir2 = heads[:, 5:8].reshape(Nb, D3, H3, W3, 3)

    to_ncdhw = lambda t: jnp.transpose(t, (0, 4, 1, 2, 3))
    return tuple(map(to_ncdhw, (odf_sh, p1, p2, dir1, dir2)))


if __name__ == "__main__":
    # Small, forward-consistent config (scaled-down channels, same structure):
    #   in_channels=8, c1=64, out_channels=16, batch=2, spatial patch 7x7x7.
    # Spatial shrink: conv trunk (two k=3 convs) 7->3, weightedSH (k=3) 3->1.
    IN_CH, C1, OUT_CH = 8, 64, 16
    N, S = 2, 7

    key = jax.random.PRNGKey(0)
    k_par, k_x = jax.random.split(key)
    params = init_params(k_par, IN_CH, C1, OUT_CH)

    # PyTorch input would be NCDHW (N, IN_CH, S, S, S); kernels use NDHWC.
    x_ncdhw = jax.random.normal(k_x, (N, IN_CH, S, S, S), jnp.float32)
    x = jnp.transpose(x_ncdhw, (0, 2, 3, 4, 1))  # -> (N, S, S, S, IN_CH)

    fwd = jax.jit(forward)
    odf_sh, p1, p2, dir1, dir2 = fwd(params, x)
    jax.block_until_ready((odf_sh, p1, p2, dir1, dir2))

    assert odf_sh.shape == (N, OUT_CH, 3, 3, 3)
    assert p1.shape == (N, 1, 1, 1, 1) and p2.shape == (N, 1, 1, 1, 1)
    assert dir1.shape == (N, 3, 1, 1, 1) and dir2.shape == (N, 3, 1, 1, 1)
    # unit-norm check on the normalized direction vectors
    n1 = jnp.sum(dir1 * dir1, axis=1)
    n2 = jnp.sum(dir2 * dir2, axis=1)
    assert bool(jnp.all(jnp.abs(n1 - 1.0) < 1e-3))
    assert bool(jnp.all(jnp.abs(n2 - 1.0) < 1e-3))
    assert bool(jnp.all(jnp.isfinite(odf_sh)))
    assert bool(jnp.all((p1 >= 0.0) & (p1 <= 1.0)))
    assert bool(jnp.all((p2 >= 0.0) & (p2 <= 1.0)))
    print("KERNEL_OK")
</pallas_src>

<mosaic_0001>
module attributes {stable_mosaic.version = 11 : i64} {
  func.func @_chain_kernel(%arg0: i32, %arg1: memref<256x216xbf16, #tpu.memory_space<vmem>>, %arg2: memref<216x64xbf16, #tpu.memory_space<vmem>>, %arg3: memref<1x64xf32, #tpu.memory_space<vmem>>, %arg4: memref<256x64xbf16, #tpu.memory_space<vmem>>) attributes {dimension_semantics = [#tpu.dimension_semantics<parallel>], iteration_bounds = array<i64: 1>, scalar_prefetch = 0 : i64, scratch_operands = 0 : i64, tpu.core_type = #tpu.core_type<tc>, window_params = [{transform_indices = @transform_0, window_bounds = array<i64: 256, 216>}, {pipeline_mode = #tpu.pipeline_mode<synchronous>, transform_indices = @transform_1, window_bounds = array<i64: 216, 64>}, {pipeline_mode = #tpu.pipeline_mode<synchronous>, transform_indices = @transform_2, window_bounds = array<i64: 1, 64>}, {transform_indices = @transform_3, window_bounds = array<i64: 256, 64>}]} {
    %c0 = arith.constant 0 : index
    %c0_0 = arith.constant 0 : index
    %0 = vector.load %arg1[%c0, %c0_0] : memref<256x216xbf16, #tpu.memory_space<vmem>>, vector<256x216xbf16>
    %c0_1 = arith.constant 0 : index
    %c0_2 = arith.constant 0 : index
    %1 = vector.load %arg2[%c0_1, %c0_2] : memref<216x64xbf16, #tpu.memory_space<vmem>>, vector<216x64xbf16>
    %c0_3 = arith.constant 0 : index
    %c0_4 = arith.constant 0 : index
    %2 = vector.load %arg3[%c0_3, %c0_4] : memref<1x64xf32, #tpu.memory_space<vmem>>, vector<1x64xf32>
    %cst = arith.constant dense<0.000000e+00> : vector<256x64xf32>
    %3 = tpu.matmul %0, %1, %cst {dimension_numbers = #tpu.dot_dimension_numbers<[1], [0], [0], [1], [0, 0, 1, 1], [], []>} : vector<256x216xbf16>, vector<216x64xbf16>, vector<256x64xf32> -> vector<256x64xf32>
    %4 = vector.broadcast %2 : vector<1x64xf32> to vector<256x64xf32>
    %5 = arith.addf %3, %4 : vector<256x64xf32>
    %cst_5 = arith.constant 0.000000e+00 : f32
    %6 = vector.broadcast %cst_5 : f32 to vector<256x64xf32>
    %7 = arith.maximumf %5, %6 : vector<256x64xf32>
    %8 = arith.truncf %7 : vector<256x64xf32> to vector<256x64xbf16>
    %c0_6 = arith.constant 0 : index
    %c0_7 = arith.constant 0 : index
    %9 = vector.load %arg4[%c0_6, %c0_7] : memref<256x64xbf16, #tpu.memory_space<vmem>>, vector<256x64xbf16>
    tpu.vector_store %arg4[%c0_6, %c0_7], %8 {strides = array<i32>} : memref<256x64xbf16, #tpu.memory_space<vmem>>, vector<256x64xbf16>,
    return
  }
  func.func @transform_0(%arg0: i32) -> (i32, i32) {
    %c0_i32 = arith.constant 0 : i32
    %c0_i32_0 = arith.constant 0 : i32
    return %arg0, %c0_i32 : i32, i32
  }
  func.func @transform_1(%arg0: i32) -> (i32, i32) {
    %c0_i32 = arith.constant 0 : i32
    %c0_i32_0 = arith.constant 0 : i32
    %c0_i32_1 = arith.constant 0 : i32
    return %c0_i32, %c0_i32_0 : i32, i32
  }
  func.func @transform_2(%arg0: i32) -> (i32, i32) {
    %c0_i32 = arith.constant 0 : i32
    %c0_i32_0 = arith.constant 0 : i32
    %c0_i32_1 = arith.constant 0 : i32
    return %c0_i32, %c0_i32_0 : i32, i32
  }
  func.func @transform_3(%arg0: i32) -> (i32, i32) {
    %c0_i32 = arith.constant 0 : i32
    %c0_i32_0 = arith.constant 0 : i32
    return %arg0, %c0_i32 : i32, i32
  }
}

module attributes {stable_mosaic.version = 11 : i64} {
  func.func @_chain_kernel(%arg0: i32, %arg1: memref<56x1728xbf16, #tpu.memory_space<vmem>>, %arg2: memref<1728x32xbf16, #tpu.memory_space<vmem>>, %arg3: memref<1x32xf32, #tpu.memory_space<vmem>>, %arg4: memref<32x32xbf16, #tpu.memory_space<vmem>>, %arg5: memref<1x32xf32, #tpu.memory_space<vmem>>, %arg6: memref<32x16xbf16, #tpu.memory_space<vmem>>, %arg7: memref<1x16xf32, #tpu.memory_space<vmem>>, %arg8: memref<16x32xbf16, #tpu.memory_space<vmem>>, %arg9: memref<1x32xf32, #tpu.memory_space<vmem>>, %arg10: memref<32x16xbf16, #tpu.memory_space<vmem>>, %arg11: memref<1x16xf32, #tpu.memory_space<vmem>>, %arg12: memref<56x16xf32, #tpu.memory_space<vmem>>) attributes {dimension_semantics = [#tpu.dimension_semantics<parallel>], iteration_bounds = array<i64: 1>, scalar_prefetch = 0 : i64, scratch_operands = 0 : i64, tpu.core_type = #tpu.core_type<tc>, window_params = [{transform_indices = @transform_0, window_bounds = array<i64: 56, 1728>}, {pipeline_mode = #tpu.pipeline_mode<synchronous>, transform_indices = @transform_1, window_bounds = array<i64: 1728, 32>}, {pipeline_mode = #tpu.pipeline_mode<synchronous>, transform_indices = @transform_2, window_bounds = array<i64: 1, 32>}, {pipeline_mode = #tpu.pipeline_mode<synchronous>, transform_indices = @transform_3, window_bounds = array<i64: 32, 32>}, {pipeline_mode = #tpu.pipeline_mode<synchronous>, transform_indices = @transform_4, window_bounds = array<i64: 1, 32>}, {pipeline_mode = #tpu.pipeline_mode<synchronous>, transform_indices = @transform_5, window_bounds = array<i64: 32, 16>}, {pipeline_mode = #tpu.pipeline_mode<synchronous>, transform_indices = @transform_6, window_bounds = array<i64: 1, 16>}, {pipeline_mode = #tpu.pipeline_mode<synchronous>, transform_indices = @transform_7, window_bounds = array<i64: 16, 32>}, {pipeline_mode = #tpu.pipeline_mode<synchronous>, transform_indices = @transform_8, window_bounds = array<i64: 1, 32>}, {pipeline_mode = #tpu.pipeline_mode<synchronous>, transform_indices = @transform_9, window_bounds = array<i64: 32, 16>}, {pipeline_mode = #tpu.pipeline_mode<synchronous>, transform_indices = @transform_10, window_bounds = array<i64: 1, 16>}, {transform_indices = @transform_11, window_bounds = array<i64: 56, 16>}]} {
    %c0 = arith.constant 0 : index
    %c0_0 = arith.constant 0 : index
    %0 = vector.load %arg1[%c0, %c0_0] : memref<56x1728xbf16, #tpu.memory_space<vmem>>, vector<56x1728xbf16>
    %c0_1 = arith.constant 0 : index
    %c0_2 = arith.constant 0 : index
    %1 = vector.load %arg2[%c0_1, %c0_2] : memref<1728x32xbf16, #tpu.memory_space<vmem>>, vector<1728x32xbf16>
    %c0_3 = arith.constant 0 : index
    %c0_4 = arith.constant 0 : index
    %2 = vector.load %arg3[%c0_3, %c0_4] : memref<1x32xf32, #tpu.memory_space<vmem>>, vector<1x32xf32>
    %cst = arith.constant dense<0.000000e+00> : vector<56x32xf32>
    %3 = tpu.matmul %0, %1, %cst {dimension_numbers = #tpu.dot_dimension_numbers<[1], [0], [0], [1], [0, 0, 1, 1], [], []>} : vector<56x1728xbf16>, vector<1728x32xbf16>, vector<56x32xf32> -> vector<56x32xf32>
    %4 = vector.broadcast %2 : vector<1x32xf32> to vector<56x32xf32>
    %5 = arith.addf %3, %4 : vector<56x32xf32>
    %cst_5 = arith.constant 0.000000e+00 : f32
    %6 = vector.broadcast %cst_5 : f32 to vector<56x32xf32>
    %7 = arith.maximumf %5, %6 : vector<56x32xf32>
    %c0_6 = arith.constant 0 : index
    %c0_7 = arith.constant 0 : index
    %8 = vector.load %arg4[%c0_6, %c0_7] : memref<32x32xbf16, #tpu.memory_space<vmem>>, vector<32x32xbf16>
    %c0_8 = arith.constant 0 : index
    %c0_9 = arith.constant 0 : index
    %9 = vector.load %arg5[%c0_8, %c0_9] : memref<1x32xf32, #tpu.memory_space<vmem>>, vector<1x32xf32>
    %10 = arith.truncf %7 : vector<56x32xf32> to vector<56x32xbf16>
    %cst_10 = arith.constant dense<0.000000e+00> : vector<56x32xf32>
    %11 = tpu.matmul %10, %8, %cst_10 {dimension_numbers = #tpu.dot_dimension_numbers<[1], [0], [0], [1], [0, 0, 1, 1], [], []>} : vector<56x32xbf16>, vector<32x32xbf16>, vector<56x32xf32> -> vector<56x32xf32>
    %12 = vector.broadcast %9 : vector<1x32xf32> to vector<56x32xf32>
    %13 = arith.addf %11, %12 : vector<56x32xf32>
    %cst_11 = arith.constant 0.000000e+00 : f32
    %14 = vector.broadcast %cst_11 : f32 to vector<56x32xf32>
    %15 = arith.maximumf %13, %14 : vector<56x32xf32>
    %c0_12 = arith.constant 0 : index
    %c0_13 = arith.constant 0 : index
    %16 = vector.load %arg6[%c0_12, %c0_13] : memref<32x16xbf16, #tpu.memory_space<vmem>>, vector<32x16xbf16>
    %c0_14 = arith.constant 0 : index
    %c0_15 = arith.constant 0 : index
    %17 = vector.load %arg7[%c0_14, %c0_15] : memref<1x16xf32, #tpu.memory_space<vmem>>, vector<1x16xf32>
    %18 = arith.truncf %15 : vector<56x32xf32> to vector<56x32xbf16>
    %cst_16 = arith.constant dense<0.000000e+00> : vector<56x16xf32>
    %19 = tpu.matmul %18, %16, %cst_16 {dimension_numbers = #tpu.dot_dimension_numbers<[1], [0], [0], [1], [0, 0, 1, 1], [], []>} : vector<56x32xbf16>, vector<32x16xbf16>, vector<56x16xf32> -> vector<56x16xf32>
    %20 = vector.broadcast %17 : vector<1x16xf32> to vector<56x16xf32>
    %21 = arith.addf %19, %20 : vector<56x16xf32>
    %cst_17 = arith.constant 0.000000e+00 : f32
    %22 = vector.broadcast %cst_17 : f32 to vector<56x16xf32>
    %23 = arith.maximumf %21, %22 : vector<56x16xf32>
    %c0_18 = arith.constant 0 : index
    %c0_19 = arith.constant 0 : index
    %24 = vector.load %arg8[%c0_18, %c0_19] : memref<16x32xbf16, #tpu.memory_space<vmem>>, vector<16x32xbf16>
    %c0_20 = arith.constant 0 : index
    %c0_21 = arith.constant 0 : index
    %25 = vector.load %arg9[%c0_20, %c0_21] : memref<1x32xf32, #tpu.memory_space<vmem>>, vector<1x32xf32>
    %26 = arith.truncf %23 : vector<56x16xf32> to vector<56x16xbf16>
    %cst_22 = arith.constant dense<0.000000e+00> : vector<56x32xf32>
    %27 = tpu.matmul %26, %24, %cst_22 {dimension_numbers = #tpu.dot_dimension_numbers<[1], [0], [0], [1], [0, 0, 1, 1], [], []>} : vector<56x16xbf16>, vector<16x32xbf16>, vector<56x32xf32> -> vector<56x32xf32>
    %28 = vector.broadcast %25 : vector<1x32xf32> to vector<56x32xf32>
    %29 = arith.addf %27, %28 : vector<56x32xf32>
    %cst_23 = arith.constant 0.000000e+00 : f32
    %30 = vector.broadcast %cst_23 : f32 to vector<56x32xf32>
    %31 = arith.maximumf %29, %30 : vector<56x32xf32>
    %c0_24 = arith.constant 0 : index
    %c0_25 = arith.constant 0 : index
    %32 = vector.load %arg10[%c0_24, %c0_25] : memref<32x16xbf16, #tpu.memory_space<vmem>>, vector<32x16xbf16>
    %c0_26 = arith.constant 0 : index
    %c0_27 = arith.constant 0 : index
    %33 = vector.load %arg11[%c0_26, %c0_27] : memref<1x16xf32, #tpu.memory_space<vmem>>, vector<1x16xf32>
    %34 = arith.truncf %31 : vector<56x32xf32> to vector<56x32xbf16>
    %cst_28 = arith.constant dense<0.000000e+00> : vector<56x16xf32>
    %35 = tpu.matmul %34, %32, %cst_28 {dimension_numbers = #tpu.dot_dimension_numbers<[1], [0], [0], [1], [0, 0, 1, 1], [], []>} : vector<56x32xbf16>, vector<32x16xbf16>, vector<56x16xf32> -> vector<56x16xf32>
    %36 = vector.broadcast %33 : vector<1x16xf32> to vector<56x16xf32>
    %37 = arith.addf %35, %36 : vector<56x16xf32>
    %c0_29 = arith.constant 0 : index
    %c0_30 = arith.constant 0 : index
    %38 = vector.load %arg12[%c0_29, %c0_30] : memref<56x16xf32, #tpu.memory_space<vmem>>, vector<56x16xf32>
    tpu.vector_store %arg12[%c0_29, %c0_30], %37 {strides = array<i32>} : memref<56x16xf32, #tpu.memory_space<vmem>>, vector<56x16xf32>,
    return
  }
  func.func @transform_0(%arg0: i32) -> (i32, i32) {
    %c0_i32 = arith.constant 0 : i32
    %c0_i32_0 = arith.constant 0 : i32
    return %arg0, %c0_i32 : i32, i32
  }
  func.func @transform_1(%arg0: i32) -> (i32, i32) {
    %c0_i32 = arith.constant 0 : i32
    %c0_i32_0 = arith.constant 0 : i32
    %c0_i32_1 = arith.constant 0 : i32
    return %c0_i32, %c0_i32_0 : i32, i32
  }
  func.func @transform_2(%arg0: i32) -> (i32, i32) {
    %c0_i32 = arith.constant 0 : i32
    %c0_i32_0 = arith.constant 0 : i32
    %c0_i32_1 = arith.constant 0 : i32
    return %c0_i32, %c0_i32_0 : i32, i32
  }
  func.func @transform_3(%arg0: i32) -> (i32, i32) {
    %c0_i32 = arith.constant 0 : i32
    %c0_i32_0 = arith.constant 0 : i32
    %c0_i32_1 = arith.constant 0 : i32
    return %c0_i32, %c0_i32_0 : i32, i32
  }
  func.func @transform_4(%arg0: i32) -> (i32, i32) {
    %c0_i32 = arith.constant 0 : i32
    %c0_i32_0 = arith.constant 0 : i32
    %c0_i32_1 = arith.constant 0 : i32
    return %c0_i32, %c0_i32_0 : i32, i32
  }
  func.func @transform_5(%arg0: i32) -> (i32, i32) {
    %c0_i32 = arith.constant 0 : i32
    %c0_i32_0 = arith.constant 0 : i32
    %c0_i32_1 = arith.constant 0 : i32
    return %c0_i32, %c0_i32_0 : i32, i32
  }
  func.func @transform_6(%arg0: i32) -> (i32, i32) {
    %c0_i32 = arith.constant 0 : i32
    %c0_i32_0 = arith.constant 0 : i32
    %c0_i32_1 = arith.constant 0 : i32
    return %c0_i32, %c0_i32_0 : i32, i32
  }
  func.func @transform_7(%arg0: i32) -> (i32, i32) {
    %c0_i32 = arith.constant 0 : i32
    %c0_i32_0 = arith.constant 0 : i32
    %c0_i32_1 = arith.constant 0 : i32
    return %c0_i32, %c0_i32_0 : i32, i32
  }
  func.func @transform_8(%arg0: i32) -> (i32, i32) {
    %c0_i32 = arith.constant 0 : i32
    %c0_i32_0 = arith.constant 0 : i32
    %c0_i32_1 = arith.constant 0 : i32
    return %c0_i32, %c0_i32_0 : i32, i32
  }
  func.func @transform_9(%arg0: i32) -> (i32, i32) {
    %c0_i32 = arith.constant 0 : i32
    %c0_i32_0 = arith.constant 0 : i32
    %c0_i32_1 = arith.constant 0 : i32
    return %c0_i32, %c0_i32_0 : i32, i32
  }
  func.func @transform_10(%arg0: i32) -> (i32, i32) {
    %c0_i32 = arith.constant 0 : i32
    %c0_i32_0 = arith.constant 0 : i32
    %c0_i32_1 = arith.constant 0 : i32
    return %c0_i32, %c0_i32_0 : i32, i32
  }
  func.func @transform_11(%arg0: i32) -> (i32, i32) {
    %c0_i32 = arith.constant 0 : i32
    %c0_i32_0 = arith.constant 0 : i32
    return %arg0, %c0_i32 : i32, i32
  }
}

module attributes {stable_mosaic.version = 11 : i64} {
  func.func @_heads_kernel(%arg0: i32, %arg1: memref<8x432xbf16, #tpu.memory_space<vmem>>, %arg2: memref<432x16xbf16, #tpu.memory_space<vmem>>, %arg3: memref<1x16xf32, #tpu.memory_space<vmem>>, %arg4: memref<16x64xbf16, #tpu.memory_space<vmem>>, %arg5: memref<1x64xf32, #tpu.memory_space<vmem>>, %arg6: memref<64x64xbf16, #tpu.memory_space<vmem>>, %arg7: memref<1x64xf32, #tpu.memory_space<vmem>>, %arg8: memref<64x2xbf16, #tpu.memory_space<vmem>>, %arg9: memref<1x2xf32, #tpu.memory_space<vmem>>, %arg10: memref<16x16xbf16, #tpu.memory_space<vmem>>, %arg11: memref<1x16xf32, #tpu.memory_space<vmem>>, %arg12: memref<16x32xbf16, #tpu.memory_space<vmem>>, %arg13: memref<1x32xf32, #tpu.memory_space<vmem>>, %arg14: memref<32x64xbf16, #tpu.memory_space<vmem>>, %arg15: memref<1x64xf32, #tpu.memory_space<vmem>>, %arg16: memref<64x32xbf16, #tpu.memory_space<vmem>>, %arg17: memref<1x32xf32, #tpu.memory_space<vmem>>, %arg18: memref<32x16xbf16, #tpu.memory_space<vmem>>, %arg19: memref<1x16xf32, #tpu.memory_space<vmem>>, %arg20: memref<16x6xbf16, #tpu.memory_space<vmem>>, %arg21: memref<1x6xf32, #tpu.memory_space<vmem>>, %arg22: memref<8x8xf32, #tpu.memory_space<vmem>>) attributes {dimension_semantics = [#tpu.dimension_semantics<parallel>], iteration_bounds = array<i64: 1>, scalar_prefetch = 0 : i64, scratch_operands = 0 : i64, tpu.core_type = #tpu.core_type<tc>, window_params = [{transform_indices = @transform_0, window_bounds = array<i64: 8, 432>}, {pipeline_mode = #tpu.pipeline_mode<synchronous>, transform_indices = @transform_1, window_bounds = array<i64: 432, 16>}, {pipeline_mode = #tpu.pipeline_mode<synchronous>, transform_indices = @transform_2, window_bounds = array<i64: 1, 16>}, {pipeline_mode = #tpu.pipeline_mode<synchronous>, transform_indices = @transform_3, window_bounds = array<i64: 16, 64>}, {pipeline_mode = #tpu.pipeline_mode<synchronous>, transform_indices = @transform_4, window_bounds = array<i64: 1, 64>}, {pipeline_mode = #tpu.pipeline_mode<synchronous>, transform_indices = @transform_5, window_bounds = array<i64: 64, 64>}, {pipeline_mode = #tpu.pipeline_mode<synchronous>, transform_indices = @transform_6, window_bounds = array<i64: 1, 64>}, {pipeline_mode = #tpu.pipeline_mode<synchronous>, transform_indices = @transform_7, window_bounds = array<i64: 64, 2>}, {pipeline_mode = #tpu.pipeline_mode<synchronous>, transform_indices = @transform_8, window_bounds = array<i64: 1, 2>}, {pipeline_mode = #tpu.pipeline_mode<synchronous>, transform_indices = @transform_9, window_bounds = array<i64: 16, 16>}, {pipeline_mode = #tpu.pipeline_mode<synchronous>, transform_indices = @transform_10, window_bounds = array<i64: 1, 16>}, {pipeline_mode = #tpu.pipeline_mode<synchronous>, transform_indices = @transform_11, window_bounds = array<i64: 16, 32>}, {pipeline_mode = #tpu.pipeline_mode<synchronous>, transform_indices = @transform_12, window_bounds = array<i64: 1, 32>}, {pipeline_mode = #tpu.pipeline_mode<synchronous>, transform_indices = @transform_13, window_bounds = array<i64: 32, 64>}, {pipeline_mode = #tpu.pipeline_mode<synchronous>, transform_indices = @transform_14, window_bounds = array<i64: 1, 64>}, {pipeline_mode = #tpu.pipeline_mode<synchronous>, transform_indices = @transform_15, window_bounds = array<i64: 64, 32>}, {pipeline_mode = #tpu.pipeline_mode<synchronous>, transform_indices = @transform_16, window_bounds = array<i64: 1, 32>}, {pipeline_mode = #tpu.pipeline_mode<synchronous>, transform_indices = @transform_17, window_bounds = array<i64: 32, 16>}, {pipeline_mode = #tpu.pipeline_mode<synchronous>, transform_indices = @transform_18, window_bounds = array<i64: 1, 16>}, {pipeline_mode = #tpu.pipeline_mode<synchronous>, transform_indices = @transform_19, window_bounds = array<i64: 16, 6>}, {pipeline_mode = #tpu.pipeline_mode<synchronous>, transform_indices = @transform_20, window_bounds = array<i64: 1, 6>}, {transform_indices = @transform_21, window_bounds = array<i64: 8, 8>}]} {
    %c0 = arith.constant 0 : index
    %c0_0 = arith.constant 0 : index
    %0 = vector.load %arg1[%c0, %c0_0] : memref<8x432xbf16, #tpu.memory_space<vmem>>, vector<8x432xbf16>
    %c0_1 = arith.constant 0 : index
    %c0_2 = arith.constant 0 : index
    %1 = vector.load %arg2[%c0_1, %c0_2] : memref<432x16xbf16, #tpu.memory_space<vmem>>, vector<432x16xbf16>
    %c0_3 = arith.constant 0 : index
    %c0_4 = arith.constant 0 : index
    %2 = vector.load %arg3[%c0_3, %c0_4] : memref<1x16xf32, #tpu.memory_space<vmem>>, vector<1x16xf32>
    %cst = arith.constant dense<0.000000e+00> : vector<8x16xf32>
    %3 = tpu.matmul %0, %1, %cst {dimension_numbers = #tpu.dot_dimension_numbers<[1], [0], [0], [1], [0, 0, 1, 1], [], []>} : vector<8x432xbf16>, vector<432x16xbf16>, vector<8x16xf32> -> vector<8x16xf32>
    %4 = vector.broadcast %2 : vector<1x16xf32> to vector<8x16xf32>
    %5 = arith.addf %3, %4 : vector<8x16xf32>
    %c0_5 = arith.constant 0 : index
    %c0_6 = arith.constant 0 : index
    %6 = vector.load %arg4[%c0_5, %c0_6] : memref<16x64xbf16, #tpu.memory_space<vmem>>, vector<16x64xbf16>
    %c0_7 = arith.constant 0 : index
    %c0_8 = arith.constant 0 : index
    %7 = vector.load %arg5[%c0_7, %c0_8] : memref<1x64xf32, #tpu.memory_space<vmem>>, vector<1x64xf32>
    %8 = arith.truncf %5 : vector<8x16xf32> to vector<8x16xbf16>
    %cst_9 = arith.constant dense<0.000000e+00> : vector<8x64xf32>
    %9 = tpu.matmul %8, %6, %cst_9 {dimension_numbers = #tpu.dot_dimension_numbers<[1], [0], [0], [1], [0, 0, 1, 1], [], []>} : vector<8x16xbf16>, vector<16x64xbf16>, vector<8x64xf32> -> vector<8x64xf32>
    %10 = vector.broadcast %7 : vector<1x64xf32> to vector<8x64xf32>
    %11 = arith.addf %9, %10 : vector<8x64xf32>
    %cst_10 = arith.constant 0.000000e+00 : f32
    %12 = vector.broadcast %cst_10 : f32 to vector<8x64xf32>
    %13 = arith.maximumf %11, %12 : vector<8x64xf32>
    %c0_11 = arith.constant 0 : index
    %c0_12 = arith.constant 0 : index
    %14 = vector.load %arg6[%c0_11, %c0_12] : memref<64x64xbf16, #tpu.memory_space<vmem>>, vector<64x64xbf16>
    %c0_13 = arith.constant 0 : index
    %c0_14 = arith.constant 0 : index
    %15 = vector.load %arg7[%c0_13, %c0_14] : memref<1x64xf32, #tpu.memory_space<vmem>>, vector<1x64xf32>
    %16 = arith.truncf %13 : vector<8x64xf32> to vector<8x64xbf16>
    %cst_15 = arith.constant dense<0.000000e+00> : vector<8x64xf32>
    %17 = tpu.matmul %16, %14, %cst_15 {dimension_numbers = #tpu.dot_dimension_numbers<[1], [0], [0], [1], [0, 0, 1, 1], [], []>} : vector<8x64xbf16>, vector<64x64xbf16>, vector<8x64xf32> -> vector<8x64xf32>
    %18 = vector.broadcast %15 : vector<1x64xf32> to vector<8x64xf32>
    %19 = arith.addf %17, %18 : vector<8x64xf32>
    %cst_16 = arith.constant 0.000000e+00 : f32
    %20 = vector.broadcast %cst_16 : f32 to vector<8x64xf32>
    %21 = arith.maximumf %19, %20 : vector<8x64xf32>
    %c0_17 = arith.constant 0 : index
    %c0_18 = arith.constant 0 : index
    %22 = vector.load %arg8[%c0_17, %c0_18] : memref<64x2xbf16, #tpu.memory_space<vmem>>, vector<64x2xbf16>
    %c0_19 = arith.constant 0 : index
    %c0_20 = arith.constant 0 : index
    %23 = vector.load %arg9[%c0_19, %c0_20] : memref<1x2xf32, #tpu.memory_space<vmem>>, vector<1x2xf32>
    %24 = arith.truncf %21 : vector<8x64xf32> to vector<8x64xbf16>
    %cst_21 = arith.constant dense<0.000000e+00> : vector<8x2xf32>
    %25 = tpu.matmul %24, %22, %cst_21 {dimension_numbers = #tpu.dot_dimension_numbers<[1], [0], [0], [1], [0, 0, 1, 1], [], []>} : vector<8x64xbf16>, vector<64x2xbf16>, vector<8x2xf32> -> vector<8x2xf32>
    %26 = vector.broadcast %23 : vector<1x2xf32> to vector<8x2xf32>
    %27 = arith.addf %25, %26 : vector<8x2xf32>
    %28 = arith.negf %27 : vector<8x2xf32>
    %29 = math.exp %28 : vector<8x2xf32>
    %cst_22 = arith.constant 1.000000e+00 : f32
    %30 = vector.broadcast %cst_22 : f32 to vector<8x2xf32>
    %31 = arith.addf %30, %29 : vector<8x2xf32>
    %32 = arith.divf %30, %31 : vector<8x2xf32>
    %c0_23 = arith.constant 0 : index
    %c0_24 = arith.constant 0 : index
    %33 = vector.load %arg10[%c0_23, %c0_24] : memref<16x16xbf16, #tpu.memory_space<vmem>>, vector<16x16xbf16>
    %c0_25 = arith.constant 0 : index
    %c0_26 = arith.constant 0 : index
    %34 = vector.load %arg11[%c0_25, %c0_26] : memref<1x16xf32, #tpu.memory_space<vmem>>, vector<1x16xf32>
    %35 = arith.truncf %5 : vector<8x16xf32> to vector<8x16xbf16>
    %cst_27 = arith.constant dense<0.000000e+00> : vector<8x16xf32>
    %36 = tpu.matmul %35, %33, %cst_27 {dimension_numbers = #tpu.dot_dimension_numbers<[1], [0], [0], [1], [0, 0, 1, 1], [], []>} : vector<8x16xbf16>, vector<16x16xbf16>, vector<8x16xf32> -> vector<8x16xf32>
    %37 = vector.broadcast %34 : vector<1x16xf32> to vector<8x16xf32>
    %38 = arith.addf %36, %37 : vector<8x16xf32>
    %cst_28 = arith.constant 0.000000e+00 : f32
    %39 = vector.broadcast %cst_28 : f32 to vector<8x16xf32>
    %40 = arith.maximumf %38, %39 : vector<8x16xf32>
    %c0_29 = arith.constant 0 : index
    %c0_30 = arith.constant 0 : index
    %41 = vector.load %arg12[%c0_29, %c0_30] : memref<16x32xbf16, #tpu.memory_space<vmem>>, vector<16x32xbf16>
    %c0_31 = arith.constant 0 : index
    %c0_32 = arith.constant 0 : index
    %42 = vector.load %arg13[%c0_31, %c0_32] : memref<1x32xf32, #tpu.memory_space<vmem>>, vector<1x32xf32>
    %43 = arith.truncf %40 : vector<8x16xf32> to vector<8x16xbf16>
    %cst_33 = arith.constant dense<0.000000e+00> : vector<8x32xf32>
    %44 = tpu.matmul %43, %41, %cst_33 {dimension_numbers = #tpu.dot_dimension_numbers<[1], [0], [0], [1], [0, 0, 1, 1], [], []>} : vector<8x16xbf16>, vector<16x32xbf16>, vector<8x32xf32> -> vector<8x32xf32>
    %45 = vector.broadcast %42 : vector<1x32xf32> to vector<8x32xf32>
    %46 = arith.addf %44, %45 : vector<8x32xf32>
    %cst_34 = arith.constant 0.000000e+00 : f32
    %47 = vector.broadcast %cst_34 : f32 to vector<8x32xf32>
    %48 = arith.maximumf %46, %47 : vector<8x32xf32>
    %c0_35 = arith.constant 0 : index
    %c0_36 = arith.constant 0 : index
    %49 = vector.load %arg14[%c0_35, %c0_36] : memref<32x64xbf16, #tpu.memory_space<vmem>>, vector<32x64xbf16>
    %c0_37 = arith.constant 0 : index
    %c0_38 = arith.constant 0 : index
    %50 = vector.load %arg15[%c0_37, %c0_38] : memref<1x64xf32, #tpu.memory_space<vmem>>, vector<1x64xf32>
    %51 = arith.truncf %48 : vector<8x32xf32> to vector<8x32xbf16>
    %cst_39 = arith.constant dense<0.000000e+00> : vector<8x64xf32>
    %52 = tpu.matmul %51, %49, %cst_39 {dimension_numbers = #tpu.dot_dimension_numbers<[1], [0], [0], [1], [0, 0, 1, 1], [], []>} : vector<8x32xbf16>, vector<32x64xbf16>, vector<8x64xf32> -> vector<8x64xf32>
    %53 = vector.broadcast %50 : vector<1x64xf32> to vector<8x64xf32>
    %54 = arith.addf %52, %53 : vector<8x64xf32>
    %cst_40 = arith.constant 0.000000e+00 : f32
    %55 = vector.broadcast %cst_40 : f32 to vector<8x64xf32>
    %56 = arith.maximumf %54, %55 : vector<8x64xf32>
    %c0_41 = arith.constant 0 : index
    %c0_42 = arith.constant 0 : index
    %57 = vector.load %arg16[%c0_41, %c0_42] : memref<64x32xbf16, #tpu.memory_space<vmem>>, vector<64x32xbf16>
    %c0_43 = arith.constant 0 : index
    %c0_44 = arith.constant 0 : index
    %58 = vector.load %arg17[%c0_43, %c0_44] : memref<1x32xf32, #tpu.memory_space<vmem>>, vector<1x32xf32>
    %59 = arith.truncf %56 : vector<8x64xf32> to vector<8x64xbf16>
    %cst_45 = arith.constant dense<0.000000e+00> : vector<8x32xf32>
    %60 = tpu.matmul %59, %57, %cst_45 {dimension_numbers = #tpu.dot_dimension_numbers<[1], [0], [0], [1], [0, 0, 1, 1], [], []>} : vector<8x64xbf16>, vector<64x32xbf16>, vector<8x32xf32> -> vector<8x32xf32>
    %61 = vector.broadcast %58 : vector<1x32xf32> to vector<8x32xf32>
    %62 = arith.addf %60, %61 : vector<8x32xf32>
    %cst_46 = arith.constant 0.000000e+00 : f32
    %63 = vector.broadcast %cst_46 : f32 to vector<8x32xf32>
    %64 = arith.maximumf %62, %63 : vector<8x32xf32>
    %c0_47 = arith.constant 0 : index
    %c0_48 = arith.constant 0 : index
    %65 = vector.load %arg18[%c0_47, %c0_48] : memref<32x16xbf16, #tpu.memory_space<vmem>>, vector<32x16xbf16>
    %c0_49 = arith.constant 0 : index
    %c0_50 = arith.constant 0 : index
    %66 = vector.load %arg19[%c0_49, %c0_50] : memref<1x16xf32, #tpu.memory_space<vmem>>, vector<1x16xf32>
    %67 = arith.truncf %64 : vector<8x32xf32> to vector<8x32xbf16>
    %cst_51 = arith.constant dense<0.000000e+00> : vector<8x16xf32>
    %68 = tpu.matmul %67, %65, %cst_51 {dimension_numbers = #tpu.dot_dimension_numbers<[1], [0], [0], [1], [0, 0, 1, 1], [], []>} : vector<8x32xbf16>, vector<32x16xbf16>, vector<8x16xf32> -> vector<8x16xf32>
    %69 = vector.broadcast %66 : vector<1x16xf32> to vector<8x16xf32>
    %70 = arith.addf %68, %69 : vector<8x16xf32>
    %cst_52 = arith.constant 0.000000e+00 : f32
    %71 = vector.broadcast %cst_52 : f32 to vector<8x16xf32>
    %72 = arith.maximumf %70, %71 : vector<8x16xf32>
    %c0_53 = arith.constant 0 : index
    %c0_54 = arith.constant 0 : index
    %73 = vector.load %arg20[%c0_53, %c0_54] : memref<16x6xbf16, #tpu.memory_space<vmem>>, vector<16x6xbf16>
    %c0_55 = arith.constant 0 : index
    %c0_56 = arith.constant 0 : index
    %74 = vector.load %arg21[%c0_55, %c0_56] : memref<1x6xf32, #tpu.memory_space<vmem>>, vector<1x6xf32>
    %75 = arith.truncf %72 : vector<8x16xf32> to vector<8x16xbf16>
    %cst_57 = arith.constant dense<0.000000e+00> : vector<8x6xf32>
    %76 = tpu.matmul %75, %73, %cst_57 {dimension_numbers = #tpu.dot_dimension_numbers<[1], [0], [0], [1], [0, 0, 1, 1], [], []>} : vector<8x16xbf16>, vector<16x6xbf16>, vector<8x6xf32> -> vector<8x6xf32>
    %77 = vector.broadcast %74 : vector<1x6xf32> to vector<8x6xf32>
    %78 = arith.addf %76, %77 : vector<8x6xf32>
    %79 = tpu.iota {dimensions = array<i32: 1>} : vector<8x6xi32>
    %cst_58 = arith.constant 0.000000e+00 : f32
    %80 = vector.broadcast %cst_58 : f32 to vector<8x6xf32>
    %c0_i32 = arith.constant 0 : i32
    %81 = vector.broadcast %c0_i32 : i32 to vector<8x6xi32>
    %82 = arith.cmpi sge, %79, %81 : vector<8x6xi32>
    %c3_i32 = arith.constant 3 : i32
    %83 = vector.broadcast %c3_i32 : i32 to vector<8x6xi32>
    %84 = arith.cmpi slt, %79, %83 : vector<8x6xi32>
    %85 = arith.andi %82, %84 : vector<8x6xi1>
    %86 = arith.mulf %78, %78 : vector<8x6xf32>
    %cst_59 = arith.constant 0.000000e+00 : f32
    %87 = vector.broadcast %cst_59 : f32 to vector<8x6xf32>
    %88 = arith.select %85, %86, %87 : vector<8x6xi1>, vector<8x6xf32>
    %cst_60 = arith.constant dense<0.000000e+00> : vector<8xf32>
    %89 = vector.multi_reduction <add>, %88, %cst_60 [1] : vector<8x6xf32> to vector<8xf32>
    %90 = vector.shape_cast %89 : vector<8xf32> to vector<8x1xf32>
    %cst_61 = arith.constant 1.000000e-24 : f32
    %91 = vector.broadcast %cst_61 : f32 to vector<8x1xf32>
    %92 = arith.maximumf %90, %91 : vector<8x1xf32>
    %93 = math.rsqrt %92 : vector<8x1xf32>
    %94 = vector.shape_cast %93 : vector<8x1xf32> to vector<8x1xf32>
    %95 = vector.broadcast %94 : vector<8x1xf32> to vector<8x6xf32>
    %96 = arith.select %85, %95, %80 : vector<8x6xi1>, vector<8x6xf32>
    %c3_i32_62 = arith.constant 3 : i32
    %97 = vector.broadcast %c3_i32_62 : i32 to vector<8x6xi32>
    %98 = arith.cmpi sge, %79, %97 : vector<8x6xi32>
    %c6_i32 = arith.constant 6 : i32
    %99 = vector.broadcast %c6_i32 : i32 to vector<8x6xi32>
    %100 = arith.cmpi slt, %79, %99 : vector<8x6xi32>
    %101 = arith.andi %98, %100 : vector<8x6xi1>
    %102 = arith.mulf %78, %78 : vector<8x6xf32>
    %cst_63 = arith.constant 0.000000e+00 : f32
    %103 = vector.broadcast %cst_63 : f32 to vector<8x6xf32>
    %104 = arith.select %101, %102, %103 : vector<8x6xi1>, vector<8x6xf32>
    %cst_64 = arith.constant dense<0.000000e+00> : vector<8xf32>
    %105 = vector.multi_reduction <add>, %104, %cst_64 [1] : vector<8x6xf32> to vector<8xf32>
    %106 = vector.shape_cast %105 : vector<8xf32> to vector<8x1xf32>
    %cst_65 = arith.constant 1.000000e-24 : f32
    %107 = vector.broadcast %cst_65 : f32 to vector<8x1xf32>
    %108 = arith.maximumf %106, %107 : vector<8x1xf32>
    %109 = math.rsqrt %108 : vector<8x1xf32>
    %110 = vector.shape_cast %109 : vector<8x1xf32> to vector<8x1xf32>
    %111 = vector.broadcast %110 : vector<8x1xf32> to vector<8x6xf32>
    %112 = arith.select %101, %111, %96 : vector<8x6xi1>, vector<8x6xf32>
    %113 = arith.mulf %78, %112 : vector<8x6xf32>
    %114 = tpu.concatenate %32, %113 in 1 : vector<8x2xf32>, vector<8x6xf32> -> vector<8x8xf32>
    %c0_66 = arith.constant 0 : index
    %c0_67 = arith.constant 0 : index
    %115 = vector.load %arg22[%c0_66, %c0_67] : memref<8x8xf32, #tpu.memory_space<vmem>>, vector<8x8xf32>
    tpu.vector_store %arg22[%c0_66, %c0_67], %114 {strides = array<i32>} : memref<8x8xf32, #tpu.memory_space<vmem>>, vector<8x8xf32>,
    return
  }
  func.func @transform_0(%arg0: i32) -> (i32, i32) {
    %c0_i32 = arith.constant 0 : i32
    %c0_i32_0 = arith.constant 0 : i32
    return %arg0, %c0_i32 : i32, i32
  }
  func.func @transform_1(%arg0: i32) -> (i32, i32) {
    %c0_i32 = arith.constant 0 : i32
    %c0_i32_0 = arith.constant 0 : i32
    %c0_i32_1 = arith.constant 0 : i32
    return %c0_i32, %c0_i32_0 : i32, i32
  }
  func.func @transform_2(%arg0: i32) -> (i32, i32) {
    %c0_i32 = arith.constant 0 : i32
    %c0_i32_0 = arith.constant 0 : i32
    %c0_i32_1 = arith.constant 0 : i32
    return %c0_i32, %c0_i32_0 : i32, i32
  }
  func.func @transform_3(%arg0: i32) -> (i32, i32) {
    %c0_i32 = arith.constant 0 : i32
    %c0_i32_0 = arith.constant 0 : i32
    %c0_i32_1 = arith.constant 0 : i32
    return %c0_i32, %c0_i32_0 : i32, i32
  }
  func.func @transform_4(%arg0: i32) -> (i32, i32) {
    %c0_i32 = arith.constant 0 : i32
    %c0_i32_0 = arith.constant 0 : i32
    %c0_i32_1 = arith.constant 0 : i32
    return %c0_i32, %c0_i32_0 : i32, i32
  }
  func.func @transform_5(%arg0: i32) -> (i32, i32) {
    %c0_i32 = arith.constant 0 : i32
    %c0_i32_0 = arith.constant 0 : i32
    %c0_i32_1 = arith.constant 0 : i32
    return %c0_i32, %c0_i32_0 : i32, i32
  }
  func.func @transform_6(%arg0: i32) -> (i32, i32) {
    %c0_i32 = arith.constant 0 : i32
    %c0_i32_0 = arith.constant 0 : i32
    %c0_i32_1 = arith.constant 0 : i32
    return %c0_i32, %c0_i32_0 : i32, i32
  }
  func.func @transform_7(%arg0: i32) -> (i32, i32) {
    %c0_i32 = arith.constant 0 : i32
    %c0_i32_0 = arith.constant 0 : i32
    %c0_i32_1 = arith.constant 0 : i32
    return %c0_i32, %c0_i32_0 : i32, i32
  }
  func.func @transform_8(%arg0: i32) -> (i32, i32) {
    %c0_i32 = arith.constant 0 : i32
    %c0_i32_0 = arith.constant 0 : i32
    %c0_i32_1 = arith.constant 0 : i32
    return %c0_i32, %c0_i32_0 : i32, i32
  }
  func.func @transform_9(%arg0: i32) -> (i32, i32) {
    %c0_i32 = arith.constant 0 : i32
    %c0_i32_0 = arith.constant 0 : i32
    %c0_i32_1 = arith.constant 0 : i32
    return %c0_i32, %c0_i32_0 : i32, i32
  }
  func.func @transform_10(%arg0: i32) -> (i32, i32) {
    %c0_i32 = arith.constant 0 : i32
    %c0_i32_0 = arith.constant 0 : i32
    %c0_i32_1 = arith.constant 0 : i32
    return %c0_i32, %c0_i32_0 : i32, i32
  }
  func.func @transform_11(%arg0: i32) -> (i32, i32) {
    %c0_i32 = arith.constant 0 : i32
    %c0_i32_0 = arith.constant 0 : i32
    %c0_i32_1 = arith.constant 0 : i32
    return %c0_i32, %c0_i32_0 : i32, i32
  }
  func.func @transform_12(%arg0: i32) -> (i32, i32) {
    %c0_i32 = arith.constant 0 : i32
    %c0_i32_0 = arith.constant 0 : i32
    %c0_i32_1 = arith.constant 0 : i32
    return %c0_i32, %c0_i32_0 : i32, i32
  }
  func.func @transform_13(%arg0: i32) -> (i32, i32) {
    %c0_i32 = arith.constant 0 : i32
    %c0_i32_0 = arith.constant 0 : i32
    %c0_i32_1 = arith.constant 0 : i32
    return %c0_i32, %c0_i32_0 : i32, i32
  }
  func.func @transform_14(%arg0: i32) -> (i32, i32) {
    %c0_i32 = arith.constant 0 : i32
    %c0_i32_0 = arith.constant 0 : i32
    %c0_i32_1 = arith.constant 0 : i32
    return %c0_i32, %c0_i32_0 : i32, i32
  }
  func.func @transform_15(%arg0: i32) -> (i32, i32) {
    %c0_i32 = arith.constant 0 : i32
    %c0_i32_0 = arith.constant 0 : i32
    %c0_i32_1 = arith.constant 0 : i32
    return %c0_i32, %c0_i32_0 : i32, i32
  }
  func.func @transform_16(%arg0: i32) -> (i32, i32) {
    %c0_i32 = arith.constant 0 : i32
    %c0_i32_0 = arith.constant 0 : i32
    %c0_i32_1 = arith.constant 0 : i32
    return %c0_i32, %c0_i32_0 : i32, i32
  }
  func.func @transform_17(%arg0: i32) -> (i32, i32) {
    %c0_i32 = arith.constant 0 : i32
    %c0_i32_0 = arith.constant 0 : i32
    %c0_i32_1 = arith.constant 0 : i32
    return %c0_i32, %c0_i32_0 : i32, i32
  }
  func.func @transform_18(%arg0: i32) -> (i32, i32) {
    %c0_i32 = arith.constant 0 : i32
    %c0_i32_0 = arith.constant 0 : i32
    %c0_i32_1 = arith.constant 0 : i32
    return %c0_i32, %c0_i32_0 : i32, i32
  }
  func.func @transform_19(%arg0: i32) -> (i32, i32) {
    %c0_i32 = arith.constant 0 : i32
    %c0_i32_0 = arith.constant 0 : i32
    %c0_i32_1 = arith.constant 0 : i32
    return %c0_i32, %c0_i32_0 : i32, i32
  }
  func.func @transform_20(%arg0: i32) -> (i32, i32) {
    %c0_i32 = arith.constant 0 : i32
    %c0_i32_0 = arith.constant 0 : i32
    %c0_i32_1 = arith.constant 0 : i32
    return %c0_i32, %c0_i32_0 : i32, i32
  }
  func.func @transform_21(%arg0: i32) -> (i32, i32) {
    %c0_i32 = arith.constant 0 : i32
    %c0_i32_0 = arith.constant 0 : i32
    return %arg0, %c0_i32 : i32, i32
  }
}

</mosaic_0001>

<bundles_post_ra>
// kernel: forward.3
= control target key start
LH: loop header
LB: loop body
LE: loop exit
PB: predicated region body
PF: predicated region fallthrough
CT: control target
= control target key end

     0   :  { %v935_v0 = vmov 0   ;;  %vm306_vm0 = vcmask 719872   ;;  %vm355_vm1 = vcmask 1043456   ;;  %vm680_vm2 = vcmask 519168   ;;  %s1303_s1 = inlined_call_operand.vmem [shape: bf16[216,64], index: 1, kind: input, shape index: {}]   ;;  %s1304_s0 = inlined_call_operand.vmem [shape: bf16[256,216], index: 0, kind: input, shape index: {}]   ;;  %s1305_s2 = inlined_call_operand.vmem [shape: f32[1,64], index: 2, kind: input, shape index: {}]   ;;  %s1306_s3 = inlined_call_operand.vmem [shape: bf16[256,64], index: 3, kind: output, shape index: {}]  }
   0x1   :  { %359 = vmatprep.subr.bf16.mxu0 %v935_v0  ;;  %844 = vmatprep.subr.bf16.mxu1 %v935_v0  ;;  %v873_v1 = vld [vmem:[%s1303_s1] sm:$0xff]   ;;  %v874_v2 = vld [vmem:[%s1303_s1 + $0x8] sm:$0xff]   ;;  %v875_v3 = vld [vmem:[%s1303_s1 + $0x10] sm:$0xff]  }
   0x2   :  { %360 = vmatpush1.bf16.msra.mxu0 %v873_v1  ;;  %858 = vmatpush1.bf16.msra.mxu1 %v873_v1  ;;  %v876_v4 = vld [vmem:[%s1303_s1 + $0x18] sm:$0xff]   ;;  %v877_v5 = vld [vmem:[%s1303_s1 + $0x20] sm:$0xff]   ;;  %v878_v8 = vld [vmem:[%s1303_s1 + $0x28] sm:$0xff]  }
   0x3   :  { %361 = vmatprep.subr.bf16.mxu0 %v935_v0  ;;  %845 = vmatprep.subr.bf16.mxu1 %v935_v0  ;;  %v889_v6 = vld [vmem:[%s1304_s0 + $0x4] ss:$8 sps:$4 sm:$0xff]   ;;  %v879_v9 = vld [vmem:[%s1303_s1 + $0x30] sm:$0xff]   ;;  %v880_v10 = vld [vmem:[%s1303_s1 + $0x38] sm:$0xff]  }
   0x4   :  { %764 = vmatprep.mubr.msk.bf16.mxu0 %vm306_vm0, %v889_v6  ;;  %v892_v7 = vld [vmem:[%s1304_s0 + $0x84] ss:$8 sps:$4 sm:$0xff]   ;;  %v883_v13 = vld [vmem:[%s1303_s1 + $0x50] sm:$0xff]   ;;  %v884_v14 = vld [vmem:[%s1303_s1 + $0x58] sm:$0xff]  }
   0x5   :  { %772 = vmatprep.mubr.msk.bf16.mxu1 %vm306_vm0, %v892_v7  ;;  %v881_v11 = vld [vmem:[%s1303_s1 + $0x40] sm:$0xff]   ;;  %v882_v12 = vld [vmem:[%s1303_s1 + $0x48] sm:$0xff]   ;;  %v893_v20 = vld [vmem:[%s1304_s0 + $0x14] ss:$8 sps:$4 sm:$0xff]  }
   0x6   :  { %362 = vmatpush1.bf16.msra.mxu0 %v874_v2  ;;  %859 = vmatpush1.bf16.msra.mxu1 %v874_v2  ;;  %v885_v15 = vld [vmem:[%s1303_s1 + $0x60] sm:$0xff]   ;;  %v886_v16 = vld [vmem:[%s1303_s1 + $0x68] ss:$0 sps:$4 sm:$0xff]   ;;  %v895_v21 = vld [vmem:[%s1304_s0 + $0x94] ss:$8 sps:$4 sm:$0xff]  }
   0x7   :  { %363 = vmatprep.subr.bf16.mxu0 %v935_v0  ;;  %846 = vmatprep.subr.bf16.mxu1 %v935_v0  ;;  %v357_v17 = vsel %vm355_vm1, %v886_v16, 0  ;;  %v887_v18 = vld [vmem:[%s1304_s0] ss:$8 sps:$4 sm:$0xff]   ;;  %v897_v22 = vld [vmem:[%s1304_s0 + $0x10] ss:$8 sps:$4 sm:$0xff]  }
   0x8   :  { %v890_v19 = vld [vmem:[%s1304_s0 + $0x80] ss:$8 sps:$4 sm:$0xff]   ;;  %v898_v23 = vld [vmem:[%s1304_s0 + $0x90] ss:$8 sps:$4 sm:$0xff]   ;;  %v899_v24 = vld [vmem:[%s1304_s0 + $0x24] ss:$8 sps:$4 sm:$0xff]  }
   0x9   :  { %v901_v25 = vld [vmem:[%s1304_s0 + $0xa4] ss:$8 sps:$4 sm:$0xff]   ;;  %v903_v26 = vld [vmem:[%s1304_s0 + $0x20] ss:$8 sps:$4 sm:$0xff]   ;;  %v905_v28 = vld [vmem:[%s1304_s0 + $0x34] ss:$8 sps:$4 sm:$0xff]  }
   0xa   :  { %364 = vmatpush1.bf16.msra.mxu0 %v875_v3  ;;  %860 = vmatpush1.bf16.msra.mxu1 %v875_v3  ;;  %v904_v27 = vld [vmem:[%s1304_s0 + $0xa0] ss:$8 sps:$4 sm:$0xff]   ;;  %v907_v29 = vld [vmem:[%s1304_s0 + $0xb4] ss:$8 sps:$4 sm:$0xff]   ;;  %v909_v30 = vld [vmem:[%s1304_s0 + $0x30] ss:$8 sps:$4 sm:$0xff]  }
   0xb   :  { %365 = vmatprep.subr.bf16.mxu0 %v935_v0  ;;  %847 = vmatprep.subr.bf16.mxu1 %v935_v0  ;;  %v910_v31 = vld [vmem:[%s1304_s0 + $0xb0] ss:$8 sps:$4 sm:$0xff]   ;;  %v911_v32 = vld [vmem:[%s1304_s0 + $0x44] ss:$8 sps:$4 sm:$0xff]   ;;  %v915_v34 = vld [vmem:[%s1304_s0 + $0x40] ss:$8 sps:$4 sm:$0xff]  }
   0xc   :  { %v913_v33 = vld [vmem:[%s1304_s0 + $0xc4] ss:$8 sps:$4 sm:$0xff]   ;;  %v916_v35 = vld [vmem:[%s1304_s0 + $0xc0] ss:$8 sps:$4 sm:$0xff]   ;;  %v917_v36 = vld [vmem:[%s1304_s0 + $0x54] ss:$8 sps:$4 sm:$0xff]  }
   0xd   :  { %v919_v37 = vld [vmem:[%s1304_s0 + $0xd4] ss:$8 sps:$4 sm:$0xff]   ;;  %v921_v38 = vld [vmem:[%s1304_s0 + $0x50] ss:$8 sps:$4 sm:$0xff]   ;;  %v923_v40 = vld [vmem:[%s1304_s0 + $0x64] ss:$8 sps:$4 sm:$0xff]  }
   0xe   :  { %366 = vmatpush1.bf16.msra.mxu0 %v876_v4  ;;  %861 = vmatpush1.bf16.msra.mxu1 %v876_v4  ;;  %v922_v39 = vld [vmem:[%s1304_s0 + $0xd0] ss:$8 sps:$4 sm:$0xff]   ;;  %v925_v41 = vld [vmem:[%s1304_s0 + $0xe4] ss:$8 sps:$4 sm:$0xff]   ;;  %v927_v42 = vld [vmem:[%s1304_s0 + $0x60] ss:$8 sps:$4 sm:$0xff]  }
   0xf   :  { %367 = vmatprep.subr.bf16.mxu0 %v935_v0  ;;  %848 = vmatprep.subr.bf16.mxu1 %v935_v0  ;;  %v928_v43 = vld [vmem:[%s1304_s0 + $0xe0] ss:$8 sps:$4 sm:$0xff]   ;;  %v929_v44 = vld [vmem:[%s1304_s0 + $0x74] ss:$8 sps:$4 sm:$0xff]   ;;  %v933_v46 = vld [vmem:[%s1304_s0 + $0x70] ss:$8 sps:$4 sm:$0xff]  }
  0x10   :  { %v931_v45 = vld [vmem:[%s1304_s0 + $0xf4] ss:$8 sps:$4 sm:$0xff]   ;;  %v934_v47 = vld [vmem:[%s1304_s0 + $0xf0] ss:$8 sps:$4 sm:$0xff]   ;;  %v1141_v48 = vld [vmem:[%s1305_s2] ss:$0 sm:$0xff] }
  0x12   :  { %368 = vmatpush1.bf16.msra.mxu0 %v877_v5  ;;  %862 = vmatpush1.bf16.msra.mxu1 %v877_v5 }
  0x13   :  { %369 = vmatprep.subr.bf16.mxu0 %v935_v0  ;;  %849 = vmatprep.subr.bf16.mxu1 %v935_v0 }
  0x16   :  { %370 = vmatpush1.bf16.msra.mxu0 %v878_v8  ;;  %863 = vmatpush1.bf16.msra.mxu1 %v878_v8 }
  0x17   :  { %371 = vmatprep.subr.bf16.mxu0 %v935_v0  ;;  %850 = vmatprep.subr.bf16.mxu1 %v935_v0 }
  0x1a   :  { %372 = vmatpush1.bf16.msra.mxu0 %v879_v9  ;;  %864 = vmatpush1.bf16.msra.mxu1 %v879_v9 }
  0x1b   :  { %373 = vmatprep.subr.bf16.mxu0 %v935_v0  ;;  %851 = vmatprep.subr.bf16.mxu1 %v935_v0 }
  0x1e   :  { %374 = vmatpush1.bf16.msra.mxu0 %v880_v10  ;;  %865 = vmatpush1.bf16.msra.mxu1 %v880_v10 }
  0x1f   :  { %375 = vmatprep.subr.bf16.mxu0 %v935_v0  ;;  %852 = vmatprep.subr.bf16.mxu1 %v935_v0 }
  0x22   :  { %376 = vmatpush1.bf16.msra.mxu0 %v881_v11  ;;  %866 = vmatpush1.bf16.msra.mxu1 %v881_v11 }
  0x23   :  { %377 = vmatprep.subr.bf16.mxu0 %v935_v0  ;;  %853 = vmatprep.subr.bf16.mxu1 %v935_v0 }
  0x26   :  { %378 = vmatpush1.bf16.msra.mxu0 %v882_v12  ;;  %867 = vmatpush1.bf16.msra.mxu1 %v882_v12 }
  0x27   :  { %379 = vmatprep.subr.bf16.mxu0 %v935_v0  ;;  %854 = vmatprep.subr.bf16.mxu1 %v935_v0 }
  0x2a   :  { %380 = vmatpush1.bf16.msra.mxu0 %v883_v13  ;;  %868 = vmatpush1.bf16.msra.mxu1 %v883_v13 }
  0x2b   :  { %381 = vmatprep.subr.bf16.mxu0 %v935_v0  ;;  %855 = vmatprep.subr.bf16.mxu1 %v935_v0 }
  0x2e   :  { %382 = vmatpush1.bf16.msra.mxu0 %v884_v14  ;;  %869 = vmatpush1.bf16.msra.mxu1 %v884_v14 }
  0x2f   :  { %383 = vmatprep.subr.bf16.mxu0 %v935_v0  ;;  %856 = vmatprep.subr.bf16.mxu1 %v935_v0 }
  0x32   :  { %384 = vmatpush1.bf16.msra.mxu0 %v885_v15  ;;  %870 = vmatpush1.bf16.msra.mxu1 %v885_v15 }
  0x33   :  { %385 = vmatprep.subr.bf16.mxu0 %v935_v0  ;;  %857 = vmatprep.subr.bf16.mxu1 %v935_v0 }
  0x36   :  { %386 = vmatpush1.bf16.msra.mxu0 %v357_v17  ;;  %871 = vmatpush1.bf16.msra.mxu1 %v357_v17 }
  0x39   :  { %392 = vmatmul.mubr.bf16.vlgmr.msra.gmra.mrb[0].mxu0 %v887_v18  ;;  %456 = vmatmul.mubr.bf16.vlgmr.msra.gmra.mrb[0].mxu1 %v890_v19 }
  0x3a   :  { %765 = vmatprep.mubr.msk.bf16.mxu0 %vm306_vm0, %v893_v20  ;;  %773 = vmatprep.mubr.msk.bf16.mxu1 %vm306_vm0, %v895_v21 }
  0x41   :  { %400 = vmatmul.mubr.bf16.gmra.mrb[4].mxu0 %v897_v22  ;;  %464 = vmatmul.mubr.bf16.gmra.mrb[4].mxu1 %v898_v23 }
  0x42   :  { %766 = vmatprep.mubr.msk.bf16.mxu0 %vm306_vm0, %v899_v24  ;;  %774 = vmatprep.mubr.msk.bf16.mxu1 %vm306_vm0, %v901_v25 }
  0x49   :  { %408 = vmatmul.mubr.bf16.gmra.mrb[8].mxu0 %v903_v26  ;;  %472 = vmatmul.mubr.bf16.gmra.mrb[8].mxu1 %v904_v27 }
  0x4a   :  { %767 = vmatprep.mubr.msk.bf16.mxu0 %vm306_vm0, %v905_v28  ;;  %775 = vmatprep.mubr.msk.bf16.mxu1 %vm306_vm0, %v907_v29 }
  0x51   :  { %416 = vmatmul.mubr.bf16.gmra.mrb[12].mxu0 %v909_v30  ;;  %480 = vmatmul.mubr.bf16.gmra.mrb[12].mxu1 %v910_v31 }
  0x52   :  { %768 = vmatprep.mubr.msk.bf16.mxu0 %vm306_vm0, %v911_v32  ;;  %776 = vmatprep.mubr.msk.bf16.mxu1 %vm306_vm0, %v913_v33 }
  0x59   :  { %424 = vmatmul.mubr.bf16.gmra.mrb[16].mxu0 %v915_v34  ;;  %488 = vmatmul.mubr.bf16.gmra.mrb[16].mxu1 %v916_v35 }
  0x5a   :  { %769 = vmatprep.mubr.msk.bf16.mxu0 %vm306_vm0, %v917_v36  ;;  %777 = vmatprep.mubr.msk.bf16.mxu1 %vm306_vm0, %v919_v37 }
  0x61   :  { %432 = vmatmul.mubr.bf16.gmra.mrb[20].mxu0 %v921_v38  ;;  %496 = vmatmul.mubr.bf16.gmra.mrb[20].mxu1 %v922_v39 }
  0x62   :  { %770 = vmatprep.mubr.msk.bf16.mxu0 %vm306_vm0, %v923_v40  ;;  %778 = vmatprep.mubr.msk.bf16.mxu1 %vm306_vm0, %v925_v41 }
  0x69   :  { %440 = vmatmul.mubr.bf16.gmra.mrb[24].mxu0 %v927_v42  ;;  %504 = vmatmul.mubr.bf16.gmra.mrb[24].mxu1 %v928_v43 }
  0x6a   :  { %771 = vmatprep.mubr.msk.bf16.mxu0 %vm306_vm0, %v929_v44  ;;  %779 = vmatprep.mubr.msk.bf16.mxu1 %vm306_vm0, %v931_v45 }
  0x71   :  { %448 = vmatmul.mubr.bf16.gmra.mrb[28].mxu0 %v933_v46  ;;  %512 = vmatmul.mubr.bf16.gmra.mrb[28].mxu1 %v934_v47 }
 0x10c   :  { %v393_v49 = vpop.f32.mrb[0].mxu0  ;;  %v457_v50 = vpop.f32.mrb[0].mxu1 }
 0x10d   :  { %v394_v51 = vadd.f32 %v1141_v48, %v393_v49  ;;  %v458_v52 = vadd.f32 %v1141_v48, %v457_v50  ;;  %v395_v53 = vpop.f32.mrb[1].mxu0  ;;  %v459_v54 = vpop.f32.mrb[1].mxu1 }
 0x10e   :  { %v396_v55 = vpop.f32.mrb[2].mxu0  ;;  %v460_v56 = vpop.f32.mrb[2].mxu1 }
 0x10f   :  { %v520_v57 = vmax.f32 %v394_v51, 0.0  ;;  %v536_v58 = vmax.f32 %v458_v52, 0.0  ;;  %v397_v59 = vadd.f32 %v1141_v48, %v396_v55  ;;  %v461_v60 = vadd.f32 %v1141_v48, %v460_v56  ;;  %v398_v61 = vpop.f32.mrb[3].mxu0  ;;  %v462_v62 = vpop.f32.mrb[3].mxu1 }
 0x111   :  { %v812_v63 = vpack.c.bf16 %v520_v57, %v520_v57  ;;  %v828_v0 = vpack.c.bf16 %v536_v58, %v536_v58  ;;  %v521_v1 = vmax.f32 %v397_v59, 0.0  ;;  %v537_v2 = vmax.f32 %v461_v60, 0.0 }
 0x113   :  { %681 = vst.msk [vmem:[%s1306_s3] sm:$0xf] %vm680_vm2, %v812_v63  ;;  %697 = vst.msk [vmem:[%s1306_s3 + $0x40] sm:$0xf] %vm680_vm2, %v828_v0  ;;  %v813_v3 = vpack.c.bf16 %v521_v1, %v521_v1  ;;  %v829_v4 = vpack.c.bf16 %v537_v2, %v537_v2 }
 0x114   :  { %v401_v5 = vpop.f32.mrb[4].mxu0  ;;  %v465_v6 = vpop.f32.mrb[4].mxu1 }
 0x115   :  { %682 = vst.msk [vmem:[%s1306_s3 + $0x4] sm:$0xf] %vm680_vm2, %v813_v3  ;;  %698 = vst.msk [vmem:[%s1306_s3 + $0x44] sm:$0xf] %vm680_vm2, %v829_v4  ;;  %v402_v7 = vadd.f32 %v1141_v48, %v401_v5  ;;  %v466_v8 = vadd.f32 %v1141_v48, %v465_v6  ;;  %v403_v9 = vpop.f32.mrb[5].mxu0  ;;  %v467_v10 = vpop.f32.mrb[5].mxu1 }
 0x116   :  { %v404_v11 = vpop.f32.mrb[6].mxu0  ;;  %v468_v12 = vpop.f32.mrb[6].mxu1 }
 0x117   :  { %v522_v13 = vmax.f32 %v402_v7, 0.0  ;;  %v538_v14 = vmax.f32 %v466_v8, 0.0  ;;  %v405_v15 = vadd.f32 %v1141_v48, %v404_v11  ;;  %v469_v16 = vadd.f32 %v1141_v48, %v468_v12  ;;  %v406_v17 = vpop.f32.mrb[7].mxu0  ;;  %v470_v18 = vpop.f32.mrb[7].mxu1 }
 0x119   :  { %v814_v19 = vpack.c.bf16 %v522_v13, %v522_v13  ;;  %v830_v20 = vpack.c.bf16 %v538_v14, %v538_v14  ;;  %v523_v21 = vmax.f32 %v405_v15, 0.0  ;;  %v539_v22 = vmax.f32 %v469_v16, 0.0 }
 0x11b   :  { %683 = vst.msk [vmem:[%s1306_s3 + $0x8] sm:$0xf] %vm680_vm2, %v814_v19  ;;  %699 = vst.msk [vmem:[%s1306_s3 + $0x48] sm:$0xf] %vm680_vm2, %v830_v20  ;;  %v815_v23 = vpack.c.bf16 %v523_v21, %v523_v21  ;;  %v831_v24 = vpack.c.bf16 %v539_v22, %v539_v22 }
 0x11c   :  { %v409_v25 = vpop.f32.mrb[8].mxu0  ;;  %v473_v26 = vpop.f32.mrb[8].mxu1 }
 0x11d   :  { %684 = vst.msk [vmem:[%s1306_s3 + $0xc] sm:$0xf] %vm680_vm2, %v815_v23  ;;  %700 = vst.msk [vmem:[%s1306_s3 + $0x4c] sm:$0xf] %vm680_vm2, %v831_v24  ;;  %v410_v27 = vadd.f32 %v1141_v48, %v409_v25  ;;  %v474_v28 = vadd.f32 %v1141_v48, %v473_v26  ;;  %v411_v29 = vpop.f32.mrb[9].mxu0  ;;  %v475_v30 = vpop.f32.mrb[9].mxu1 }
 0x11e   :  { %v412_v31 = vpop.f32.mrb[10].mxu0  ;;  %v476_v32 = vpop.f32.mrb[10].mxu1 }
 0x11f   :  { %v524_v33 = vmax.f32 %v410_v27, 0.0  ;;  %v540_v34 = vmax.f32 %v474_v28, 0.0  ;;  %v413_v35 = vadd.f32 %v1141_v48, %v412_v31  ;;  %v477_v36 = vadd.f32 %v1141_v48, %v476_v32  ;;  %v414_v37 = vpop.f32.mrb[11].mxu0  ;;  %v478_v38 = vpop.f32.mrb[11].mxu1 }
 0x121   :  { %v816_v39 = vpack.c.bf16 %v524_v33, %v524_v33  ;;  %v832_v40 = vpack.c.bf16 %v540_v34, %v540_v34  ;;  %v525_v41 = vmax.f32 %v413_v35, 0.0  ;;  %v541_v42 = vmax.f32 %v477_v36, 0.0 }
 0x123   :  { %685 = vst.msk [vmem:[%s1306_s3 + $0x10] sm:$0xf] %vm680_vm2, %v816_v39  ;;  %701 = vst.msk [vmem:[%s1306_s3 + $0x50] sm:$0xf] %vm680_vm2, %v832_v40  ;;  %v817_v43 = vpack.c.bf16 %v525_v41, %v525_v41  ;;  %v833_v44 = vpack.c.bf16 %v541_v42, %v541_v42 }
 0x124   :  { %v417_v45 = vpop.f32.mrb[12].mxu0  ;;  %v481_v46 = vpop.f32.mrb[12].mxu1 }
 0x125   :  { %686 = vst.msk [vmem:[%s1306_s3 + $0x14] sm:$0xf] %vm680_vm2, %v817_v43  ;;  %702 = vst.msk [vmem:[%s1306_s3 + $0x54] sm:$0xf] %vm680_vm2, %v833_v44  ;;  %v418_v47 = vadd.f32 %v1141_v48, %v417_v45  ;;  %v482_v49 = vadd.f32 %v1141_v48, %v481_v46  ;;  %v419_v50 = vpop.f32.mrb[13].mxu0  ;;  %v483_v51 = vpop.f32.mrb[13].mxu1 }
 0x126   :  { %v420_v52 = vpop.f32.mrb[14].mxu0  ;;  %v484_v53 = vpop.f32.mrb[14].mxu1 }
 0x127   :  { %v526_v54 = vmax.f32 %v418_v47, 0.0  ;;  %v542_v55 = vmax.f32 %v482_v49, 0.0  ;;  %v421_v56 = vadd.f32 %v1141_v48, %v420_v52  ;;  %v485_v57 = vadd.f32 %v1141_v48, %v484_v53  ;;  %v422_v58 = vpop.f32.mrb[15].mxu0  ;;  %v486_v59 = vpop.f32.mrb[15].mxu1 }
 0x129   :  { %v818_v60 = vpack.c.bf16 %v526_v54, %v526_v54  ;;  %v834_v61 = vpack.c.bf16 %v542_v55, %v542_v55  ;;  %v527_v62 = vmax.f32 %v421_v56, 0.0  ;;  %v543_v63 = vmax.f32 %v485_v57, 0.0 }
 0x12b   :  { %687 = vst.msk [vmem:[%s1306_s3 + $0x18] sm:$0xf] %vm680_vm2, %v818_v60  ;;  %703 = vst.msk [vmem:[%s1306_s3 + $0x58] sm:$0xf] %vm680_vm2, %v834_v61  ;;  %v819_v0 = vpack.c.bf16 %v527_v62, %v527_v62  ;;  %v835_v1 = vpack.c.bf16 %v543_v63, %v543_v63 }
 0x12c   :  { %v425_v2 = vpop.f32.mrb[16].mxu0  ;;  %v489_v3 = vpop.f32.mrb[16].mxu1 }
 0x12d   :  { %688 = vst.msk [vmem:[%s1306_s3 + $0x1c] sm:$0xf] %vm680_vm2, %v819_v0  ;;  %704 = vst.msk [vmem:[%s1306_s3 + $0x5c] sm:$0xf] %vm680_vm2, %v835_v1  ;;  %v426_v4 = vadd.f32 %v1141_v48, %v425_v2  ;;  %v490_v5 = vadd.f32 %v1141_v48, %v489_v3  ;;  %v427_v6 = vpop.f32.mrb[17].mxu0  ;;  %v491_v7 = vpop.f32.mrb[17].mxu1 }
 0x12e   :  { %v428_v8 = vpop.f32.mrb[18].mxu0  ;;  %v492_v9 = vpop.f32.mrb[18].mxu1 }
 0x12f   :  { %v528_v10 = vmax.f32 %v426_v4, 0.0  ;;  %v544_v11 = vmax.f32 %v490_v5, 0.0  ;;  %v429_v12 = vadd.f32 %v1141_v48, %v428_v8  ;;  %v493_v13 = vadd.f32 %v1141_v48, %v492_v9  ;;  %v430_v14 = vpop.f32.mrb[19].mxu0  ;;  %v494_v15 = vpop.f32.mrb[19].mxu1 }
 0x131   :  { %v820_v16 = vpack.c.bf16 %v528_v10, %v528_v10  ;;  %v836_v17 = vpack.c.bf16 %v544_v11, %v544_v11  ;;  %v529_v18 = vmax.f32 %v429_v12, 0.0  ;;  %v545_v19 = vmax.f32 %v493_v13, 0.0 }
 0x133   :  { %689 = vst.msk [vmem:[%s1306_s3 + $0x20] sm:$0xf] %vm680_vm2, %v820_v16  ;;  %705 = vst.msk [vmem:[%s1306_s3 + $0x60] sm:$0xf] %vm680_vm2, %v836_v17  ;;  %v821_v20 = vpack.c.bf16 %v529_v18, %v529_v18  ;;  %v837_v21 = vpack.c.bf16 %v545_v19, %v545_v19 }
 0x134   :  { %v433_v22 = vpop.f32.mrb[20].mxu0  ;;  %v497_v23 = vpop.f32.mrb[20].mxu1 }
 0x135   :  { %690 = vst.msk [vmem:[%s1306_s3 + $0x24] sm:$0xf] %vm680_vm2, %v821_v20  ;;  %706 = vst.msk [vmem:[%s1306_s3 + $0x64] sm:$0xf] %vm680_vm2, %v837_v21  ;;  %v434_v24 = vadd.f32 %v1141_v48, %v433_v22  ;;  %v498_v25 = vadd.f32 %v1141_v48, %v497_v23  ;;  %v435_v26 = vpop.f32.mrb[21].mxu0  ;;  %v499_v27 = vpop.f32.mrb[21].mxu1 }
 0x136   :  { %v436_v28 = vpop.f32.mrb[22].mxu0  ;;  %v500_v29 = vpop.f32.mrb[22].mxu1 }
 0x137   :  { %v530_v30 = vmax.f32 %v434_v24, 0.0  ;;  %v546_v31 = vmax.f32 %v498_v25, 0.0  ;;  %v437_v32 = vadd.f32 %v1141_v48, %v436_v28  ;;  %v501_v33 = vadd.f32 %v1141_v48, %v500_v29  ;;  %v438_v34 = vpop.f32.mrb[23].mxu0  ;;  %v502_v35 = vpop.f32.mrb[23].mxu1 }
 0x139   :  { %v822_v36 = vpack.c.bf16 %v530_v30, %v530_v30  ;;  %v838_v37 = vpack.c.bf16 %v546_v31, %v546_v31  ;;  %v531_v38 = vmax.f32 %v437_v32, 0.0  ;;  %v547_v39 = vmax.f32 %v501_v33, 0.0 }
 0x13b   :  { %691 = vst.msk [vmem:[%s1306_s3 + $0x28] sm:$0xf] %vm680_vm2, %v822_v36  ;;  %707 = vst.msk [vmem:[%s1306_s3 + $0x68] sm:$0xf] %vm680_vm2, %v838_v37  ;;  %v823_v40 = vpack.c.bf16 %v531_v38, %v531_v38  ;;  %v839_v41 = vpack.c.bf16 %v547_v39, %v547_v39 }
 0x13c   :  { %v441_v42 = vpop.f32.mrb[24].mxu0  ;;  %v505_v43 = vpop.f32.mrb[24].mxu1 }
 0x13d   :  { %692 = vst.msk [vmem:[%s1306_s3 + $0x2c] sm:$0xf] %vm680_vm2, %v823_v40  ;;  %708 = vst.msk [vmem:[%s1306_s3 + $0x6c] sm:$0xf] %vm680_vm2, %v839_v41  ;;  %v442_v44 = vadd.f32 %v1141_v48, %v441_v42  ;;  %v506_v45 = vadd.f32 %v1141_v48, %v505_v43  ;;  %v443_v46 = vpop.f32.mrb[25].mxu0  ;;  %v507_v47 = vpop.f32.mrb[25].mxu1 }
 0x13e   :  { %v444_v49 = vpop.f32.mrb[26].mxu0  ;;  %v508_v50 = vpop.f32.mrb[26].mxu1 }
 0x13f   :  { %v532_v51 = vmax.f32 %v442_v44, 0.0  ;;  %v548_v52 = vmax.f32 %v506_v45, 0.0  ;;  %v445_v53 = vadd.f32 %v1141_v48, %v444_v49  ;;  %v509_v54 = vadd.f32 %v1141_v48, %v508_v50  ;;  %v446_v55 = vpop.f32.mrb[27].mxu0  ;;  %v510_v56 = vpop.f32.mrb[27].mxu1 }
 0x141   :  { %v824_v57 = vpack.c.bf16 %v532_v51, %v532_v51  ;;  %v840_v58 = vpack.c.bf16 %v548_v52, %v548_v52  ;;  %v533_v59 = vmax.f32 %v445_v53, 0.0  ;;  %v549_v60 = vmax.f32 %v509_v54, 0.0 }
 0x143   :  { %693 = vst.msk [vmem:[%s1306_s3 + $0x30] sm:$0xf] %vm680_vm2, %v824_v57  ;;  %709 = vst.msk [vmem:[%s1306_s3 + $0x70] sm:$0xf] %vm680_vm2, %v840_v58  ;;  %v825_v61 = vpack.c.bf16 %v533_v59, %v533_v59  ;;  %v841_v62 = vpack.c.bf16 %v549_v60, %v549_v60 }
 0x144   :  { %v449_v63 = vpop.f32.mrb[28].mxu0  ;;  %v513_v0 = vpop.f32.mrb[28].mxu1 }
 0x145   :  { %694 = vst.msk [vmem:[%s1306_s3 + $0x34] sm:$0xf] %vm680_vm2, %v825_v61  ;;  %710 = vst.msk [vmem:[%s1306_s3 + $0x74] sm:$0xf] %vm680_vm2, %v841_v62  ;;  %v450_v1 = vadd.f32 %v1141_v48, %v449_v63  ;;  %v514_v2 = vadd.f32 %v1141_v48, %v513_v0  ;;  %v451_v3 = vpop.f32.mrb[29].mxu0  ;;  %v515_v4 = vpop.f32.mrb[29].mxu1 }
 0x146   :  { %v452_v5 = vpop.f32.mrb[30].mxu0  ;;  %v516_v6 = vpop.f32.mrb[30].mxu1 }
 0x147   :  { %v534_v7 = vmax.f32 %v450_v1, 0.0  ;;  %v550_v8 = vmax.f32 %v514_v2, 0.0  ;;  %v453_v9 = vadd.f32 %v1141_v48, %v452_v5  ;;  %v517_v10 = vadd.f32 %v1141_v48, %v516_v6  ;;  %v454_v11 = vpop.f32.mrb[31].mxu0  ;;  %v518_v12 = vpop.f32.mrb[31].mxu1 }
 0x149   :  { %v826_v13 = vpack.c.bf16 %v534_v7, %v534_v7  ;;  %v842_v14 = vpack.c.bf16 %v550_v8, %v550_v8  ;;  %v535_v15 = vmax.f32 %v453_v9, 0.0  ;;  %v551_v16 = vmax.f32 %v517_v10, 0.0 }
 0x14b   :  { %695 = vst.msk [vmem:[%s1306_s3 + $0x38] sm:$0xf] %vm680_vm2, %v826_v13  ;;  %711 = vst.msk [vmem:[%s1306_s3 + $0x78] sm:$0xf] %vm680_vm2, %v842_v14  ;;  %v827_v17 = vpack.c.bf16 %v535_v15, %v535_v15  ;;  %v843_v18 = vpack.c.bf16 %v551_v16, %v551_v16 }
 0x14d   :  { %696 = vst.msk [vmem:[%s1306_s3 + $0x3c] sm:$0xf] %vm680_vm2, %v827_v17  ;;  %712 = vst.msk [vmem:[%s1306_s3 + $0x7c] sm:$0xf] %vm680_vm2, %v843_v18 }

// kernel: forward.4
= control target key start
LH: loop header
LB: loop body
LE: loop exit
PB: predicated region body
PF: predicated region fallthrough
CT: control target
= control target key end

     0   :  { %vm1214_vm0 = vcmask 523264   ;;  %vm1709_vm1 = vcmask 261120   ;;  %vm1922_vm2 = vcmask 130048   ;;  %s3450_s1 = inlined_call_operand.vmem [shape: bf16[1728,32], index: 1, kind: input, shape index: {}]   ;;  %s3451_s0 = inlined_call_operand.vmem [shape: bf16[56,1728], index: 0, kind: input, shape index: {}]   ;;  %s3452_s3 = inlined_call_operand.vmem [shape: bf16[32,32], index: 3, kind: input, shape index: {}]   ;;  %s3453_s2 = inlined_call_operand.vmem [shape: f32[1,32], index: 2, kind: input, shape index: {}]   ;;  %s3454_s5 = inlined_call_operand.vmem [shape: bf16[32,16], index: 5, kind: input, shape index: {}]   ;;  %s3455_s4 = inlined_call_operand.vmem [shape: f32[1,32], index: 4, kind: input, shape index: {}]   ;;  %s3456_s7 = inlined_call_operand.vmem [shape: bf16[16,32], index: 7, kind: input, shape index: {}]   ;;  %s3457_s9 = inlined_call_operand.vmem [shape: bf16[32,16], index: 9, kind: input, shape index: {}]   ;;  %s3458_s6 = inlined_call_operand.vmem [shape: f32[1,16], index: 6, kind: input, shape index: {}]   ;;  %s3459_s8 = inlined_call_operand.vmem [shape: f32[1,32], index: 8, kind: input, shape index: {}]   ;;  %s3460_s10 = inlined_call_operand.vmem [shape: f32[1,16], index: 10, kind: input, shape index: {}]   ;;  %s3461_s11 = inlined_call_operand.vmem [shape: f32[56,16], index: 11, kind: output, shape index: {}]  }
   0x1   :  { %v2630_v0 = vld [vmem:[%s3450_s1 + $0x40] sm:$0xff]   ;;  %v2634_v4 = vld [vmem:[%s3450_s1 + $0x48] sm:$0xff]   ;;  %v2638_v8 = vld [vmem:[%s3450_s1 + $0x50] sm:$0xff]  }
   0x2   :  { %v2631_v1 = vld [vmem:[%s3450_s1] sm:$0xff]   ;;  %2316 = vmatprep.subr.bf16.mxu0 %v2630_v0  ;;  %v2635_v5 = vld [vmem:[%s3450_s1 + $0x8] sm:$0xff]   ;;  %v2639_v9 = vld [vmem:[%s3450_s1 + $0x10] sm:$0xff]  }
   0x3   :  { %v2632_v2 = vld [vmem:[%s3450_s1 + $0xc0] sm:$0xff]   ;;  %2317 = vmatpush3.bf16.msra.mxu0 %v2631_v1  ;;  %v2636_v6 = vld [vmem:[%s3450_s1 + $0xc8] sm:$0xff]   ;;  %v2640_v10 = vld [vmem:[%s3450_s1 + $0xd0] sm:$0xff]  }
   0x4   :  { %v2633_v3 = vld [vmem:[%s3450_s1 + $0x80] sm:$0xff]   ;;  %2356 = vmatprep.subr.bf16.mxu1 %v2632_v2  ;;  %2318 = vmatprep.subr.bf16.mxu0 %v2634_v4  ;;  %v2637_v7 = vld [vmem:[%s3450_s1 + $0x88] sm:$0xff]   ;;  %v2641_v11 = vld [vmem:[%s3450_s1 + $0x90] sm:$0xff]  }
   0x5   :  { %2357 = vmatpush3.bf16.msra.mxu1 %v2633_v3  ;;  %v2642_v12 = vld [vmem:[%s3450_s1 + $0x58] sm:$0xff]   ;;  %v2646_v16 = vld [vmem:[%s3450_s1 + $0x60] sm:$0xff]   ;;  %v2650_v20 = vld [vmem:[%s3450_s1 + $0x68] sm:$0xff]  }
   0x6   :  { %2358 = vmatprep.subr.bf16.mxu1 %v2636_v6  ;;  %v2643_v13 = vld [vmem:[%s3450_s1 + $0x18] sm:$0xff]   ;;  %v2647_v17 = vld [vmem:[%s3450_s1 + $0x20] sm:$0xff]   ;;  %v2651_v21 = vld [vmem:[%s3450_s1 + $0x28] sm:$0xff]  }
   0x7   :  { %2319 = vmatpush3.bf16.msra.mxu0 %v2635_v5  ;;  %v2644_v14 = vld [vmem:[%s3450_s1 + $0xd8] sm:$0xff]   ;;  %v2648_v18 = vld [vmem:[%s3450_s1 + $0xe0] sm:$0xff]   ;;  %v2652_v22 = vld [vmem:[%s3450_s1 + $0xe8] sm:$0xff]  }
   0x8   :  { %2320 = vmatprep.subr.bf16.mxu0 %v2638_v8  ;;  %v2645_v15 = vld [vmem:[%s3450_s1 + $0x98] sm:$0xff]   ;;  %v2649_v19 = vld [vmem:[%s3450_s1 + $0xa0] sm:$0xff]   ;;  %v2653_v23 = vld [vmem:[%s3450_s1 + $0xa8] sm:$0xff]  }
   0x9   :  { %2359 = vmatpush3.bf16.msra.mxu1 %v2637_v7  ;;  %v2654_v24 = vld [vmem:[%s3450_s1 + $0x70] sm:$0xff]   ;;  %v2658_v28 = vld [vmem:[%s3450_s1 + $0x78] sm:$0xff]   ;;  %v2665_v34 = vld [vmem:[%s3450_s1 + $0x140] sm:$0xff]  }
   0xa   :  { %2360 = vmatprep.subr.bf16.mxu1 %v2640_v10  ;;  %v2655_v25 = vld [vmem:[%s3450_s1 + $0x30] sm:$0xff]   ;;  %v2659_v29 = vld [vmem:[%s3450_s1 + $0x38] sm:$0xff]   ;;  %v2666_v35 = vld [vmem:[%s3451_s0 + $0x8] ss:$56 sps:$4 sm:$0xff]  }
   0xb   :  { %2321 = vmatpush3.bf16.msra.mxu0 %v2639_v9  ;;  %v2656_v26 = vld [vmem:[%s3450_s1 + $0xf0] sm:$0xff]   ;;  %v2660_v30 = vld [vmem:[%s3450_s1 + $0xf8] sm:$0xff]   ;;  %v2668_v36 = vld [vmem:[%s3451_s0 + $0xc] ss:$56 sps:$4 sm:$0xff]  }
   0xc   :  { %2322 = vmatprep.subr.bf16.mxu0 %v2642_v12  ;;  %v2657_v27 = vld [vmem:[%s3450_s1 + $0xb0] sm:$0xff]   ;;  %v2661_v31 = vld [vmem:[%s3451_s0] ss:$56 sps:$4 sm:$0xff]   ;;  %v2663_v32 = vld [vmem:[%s3451_s0 + $0x4] ss:$56 sps:$4 sm:$0xff]   ;;  %1323 = vmatprep.mubr.bf16.mxu1 %v2668_v36 }
   0xd   :  { %2361 = vmatpush3.bf16.msra.mxu1 %v2641_v11  ;;  %v2664_v33 = vld [vmem:[%s3450_s1 + $0xb8] sm:$0xff]   ;;  %1259 = vmatprep.mubr.bf16.mxu0 %v2663_v32  ;;  %v2669_v37 = vld [vmem:[%s3450_s1 + $0x100] sm:$0xff]   ;;  %v2672_v40 = vld [vmem:[%s3450_s1 + $0x148] sm:$0xff]  }
   0xe   :  { %2362 = vmatprep.subr.bf16.mxu1 %v2644_v14  ;;  %v2670_v38 = vld [vmem:[%s3450_s1 + $0x1c0] sm:$0xff]   ;;  %v2673_v41 = vld [vmem:[%s3450_s1 + $0x108] sm:$0xff]   ;;  %v2679_v46 = vld [vmem:[%s3450_s1 + $0x150] sm:$0xff]  }
   0xf   :  { %2323 = vmatpush3.bf16.msra.mxu0 %v2643_v13  ;;  %v2671_v39 = vld [vmem:[%s3450_s1 + $0x180] sm:$0xff]   ;;  %v2674_v42 = vld [vmem:[%s3450_s1 + $0x1c8] sm:$0xff]   ;;  %v2680_v47 = vld [vmem:[%s3451_s0 + $0x7c] ss:$56 sps:$4 sm:$0xff]  }
  0x10   :  { %2324 = vmatprep.subr.bf16.mxu0 %v2646_v16  ;;  %v2675_v43 = vld [vmem:[%s3451_s0 + $0x74] ss:$56 sps:$4 sm:$0xff]   ;;  %v2678_v45 = vld [vmem:[%s3451_s0 + $0x70] ss:$56 sps:$4 sm:$0xff]   ;;  %v2686_v52 = vld [vmem:[%s3450_s1 + $0x158] sm:$0xff]  }
  0x11   :  { %2363 = vmatpush3.bf16.msra.mxu1 %v2645_v15  ;;  %v2677_v44 = vld [vmem:[%s3450_s1 + $0x188] sm:$0xff]   ;;  %v2682_v48 = vld [vmem:[%s3450_s1 + $0x110] sm:$0xff]   ;;  %v2687_v53 = vld [vmem:[%s3450_s1 + $0x118] sm:$0xff]  }
  0x12   :  { %2364 = vmatprep.subr.bf16.mxu1 %v2648_v18  ;;  %v2683_v49 = vld [vmem:[%s3451_s0 + $0x78] ss:$56 sps:$4 sm:$0xff]   ;;  %v2689_v55 = vld [vmem:[%s3451_s0 + $0xe4] ss:$56 sps:$4 sm:$0xff]   ;;  %v2697_v61 = vld [vmem:[%s3451_s0 + $0xe8] ss:$56 sps:$4 sm:$0xff]  }
  0x13   :  { %2325 = vmatpush3.bf16.msra.mxu0 %v2647_v17  ;;  %v2684_v50 = vld [vmem:[%s3450_s1 + $0x1d0] sm:$0xff]   ;;  %v2688_v54 = vld [vmem:[%s3450_s1 + $0x1d8] sm:$0xff]   ;;  %v2693_v58 = vld [vmem:[%s3450_s1 + $0x160] sm:$0xff]  }
  0x14   :  { %2326 = vmatprep.subr.bf16.mxu0 %v2650_v20  ;;  %v2685_v51 = vld [vmem:[%s3450_s1 + $0x190] sm:$0xff]   ;;  %v2691_v56 = vld [vmem:[%s3450_s1 + $0x198] sm:$0xff]   ;;  %v2694_v59 = vld [vmem:[%s3451_s0 + $0xec] ss:$56 sps:$4 sm:$0xff]  }
  0x15   :  { %2365 = vmatpush3.bf16.msra.mxu1 %v2649_v19  ;;  %v2692_v57 = vld [vmem:[%s3451_s0 + $0xe0] ss:$56 sps:$4 sm:$0xff]   ;;  %v2700_v0 = vld [vmem:[%s3450_s1 + $0x168] sm:$0xff]   ;;  %v81_v3 = vld [vmem:[%s3451_s0 + $0x150] sm:$0xff] }
  0x16   :  { %2366 = vmatprep.subr.bf16.mxu1 %v2652_v22  ;;  %v2696_v60 = vld [vmem:[%s3450_s1 + $0x120] sm:$0xff]   ;;  %v2701_v1 = vld [vmem:[%s3450_s1 + $0x128] sm:$0xff]   ;;  %v2164_v4 = vcombine.high %v81_v3, %v81_v3  ;;  %v2163_v6 = vcombine.low %v81_v3, %v81_v3  ;;  %v2706_v7 = vld [vmem:[%s3450_s1 + $0x170] sm:$0xff]  }
  0x17   :  { %2327 = vmatpush3.bf16.msra.mxu0 %v2651_v21  ;;  %v2698_v62 = vld [vmem:[%s3450_s1 + $0x1e0] sm:$0xff]   ;;  %v2702_v2 = vld [vmem:[%s3450_s1 + $0x1e8] sm:$0xff]   ;;  %v82_v8 = vld [vmem:[%s3451_s0 + $0x158] sm:$0xff] }
  0x18   :  { %2328 = vmatprep.subr.bf16.mxu0 %v2654_v24  ;;  %v2699_v63 = vld [vmem:[%s3450_s1 + $0x1a0] sm:$0xff]   ;;  %v2704_v5 = vld [vmem:[%s3450_s1 + $0x1a8] sm:$0xff]   ;;  %v2166_v9 = vcombine.high %v82_v8, %v82_v8  ;;  %v2708_v10 = vld [vmem:[%s3450_s1 + $0x130] sm:$0xff]   ;;  %v2165_v11 = vcombine.low %v82_v8, %v82_v8 }
  0x19   :  { %2367 = vmatpush3.bf16.msra.mxu1 %v2653_v23  ;;  %v2710_v12 = vld [vmem:[%s3450_s1 + $0x1f0] sm:$0xff]   ;;  %v2712_v14 = vld [vmem:[%s3450_s1 + $0x178] sm:$0xff]   ;;  %v2719_v20 = vld [vmem:[%s3450_s1 + $0x240] sm:$0xff]  }
  0x1a   :  { %2368 = vmatprep.subr.bf16.mxu1 %v2656_v26  ;;  %v2711_v13 = vld [vmem:[%s3450_s1 + $0x1b0] sm:$0xff]   ;;  %v2713_v15 = vld [vmem:[%s3450_s1 + $0x138] sm:$0xff]   ;;  %v2723_v23 = vld [vmem:[%s3450_s1 + $0x200] sm:$0xff]  }
  0x1b   :  { %2329 = vmatpush3.bf16.msra.mxu0 %v2655_v25  ;;  %v2714_v16 = vld [vmem:[%s3450_s1 + $0x1f8] sm:$0xff]   ;;  %v2715_v17 = vld [vmem:[%s3451_s0 + $0x10] ss:$56 sps:$4 sm:$0xff]   ;;  %v2717_v18 = vld [vmem:[%s3451_s0 + $0x14] ss:$56 sps:$4 sm:$0xff]  }
  0x1c   :  { %2330 = vmatprep.subr.bf16.mxu0 %v2658_v28  ;;  %v2718_v19 = vld [vmem:[%s3450_s1 + $0x1b8] sm:$0xff]   ;;  %v2724_v24 = vld [vmem:[%s3450_s1 + $0x2c0] sm:$0xff]   ;;  %v2726_v26 = vld [vmem:[%s3450_s1 + $0x248] sm:$0xff]  }
  0x1d   :  { %2369 = vmatpush3.bf16.msra.mxu1 %v2657_v27  ;;  %v2720_v21 = vld [vmem:[%s3451_s0 + $0x18] ss:$56 sps:$4 sm:$0xff]   ;;  %v2722_v22 = vld [vmem:[%s3451_s0 + $0x1c] ss:$56 sps:$4 sm:$0xff]   ;;  %v2725_v25 = vld [vmem:[%s3450_s1 + $0x280] sm:$0xff]  }
  0x1e   :  { %2370 = vmatprep.subr.bf16.mxu1 %v2660_v30  ;;  %v2727_v27 = vld [vmem:[%s3450_s1 + $0x208] sm:$0xff]   ;;  %v2733_v32 = vld [vmem:[%s3450_s1 + $0x250] sm:$0xff]   ;;  %v2769_v3 = vld [vmem:[%s3451_s0 + $0x20] ss:$56 sps:$4 sm:$0xff]  }
  0x1f   :  { %2331 = vmatpush3.bf16.msra.mxu0 %v2659_v29  ;;  %v2728_v28 = vld [vmem:[%s3450_s1 + $0x2c8] sm:$0xff]   ;;  %v2729_v29 = vld [vmem:[%s3451_s0 + $0x84] ss:$56 sps:$4 sm:$0xff]   ;;  %v2738_v36 = vld [vmem:[%s3450_s1 + $0x2d0] sm:$0xff]  }
  0x20   :  { %2396 = vmatprep.subr.bf16.mxu0 %v2665_v34  ;;  %v2731_v30 = vld [vmem:[%s3450_s1 + $0x288] sm:$0xff]   ;;  %v2736_v34 = vld [vmem:[%s3450_s1 + $0x210] sm:$0xff]  }
  0x21   :  { %2371 = vmatpush3.bf16.msra.mxu1 %v2664_v33  ;;  %v2734_v33 = vld [vmem:[%s3451_s0 + $0x8c] ss:$56 sps:$4 sm:$0xff]  }
  0x22   :  { %1260 = vmatmul.mubr.bf16.vlgmr.msra.gmra.mrb[0].mxu0 %v2661_v31  ;;  %2436 = vmatprep.subr.bf16.mxu1 %v2670_v38  ;;  %v2732_v31 = vld [vmem:[%s3451_s0 + $0x80] ss:$56 sps:$4 sm:$0xff]   ;;  %v2775_v8 = vld [vmem:[%s3451_s0 + $0x2c] ss:$56 sps:$4 sm:$0xff]  }
  0x23   :  { %2397 = vmatpush3.bf16.msra.mxu0 %v2669_v37  ;;  %1267 = vmatprep.mubr.bf16.mxu0 %v2675_v43  ;;  %v2739_v37 = vld [vmem:[%s3450_s1 + $0x290] sm:$0xff]   ;;  %v2740_v38 = vld [vmem:[%s3450_s1 + $0x258] sm:$0xff]  }
  0x24   :  { %1324 = vmatmul.mubr.bf16.vlgmr.msra.gmra.mrb[0].mxu1 %v2666_v35  ;;  %2398 = vmatprep.subr.bf16.mxu0 %v2672_v40  ;;  %v2737_v35 = vld [vmem:[%s3451_s0 + $0x88] ss:$56 sps:$4 sm:$0xff]   ;;  %v2742_v40 = vld [vmem:[%s3450_s1 + $0x2d8] sm:$0xff]  }
  0x25   :  { %2437 = vmatpush3.bf16.msra.mxu1 %v2671_v39  ;;  %1331 = vmatprep.mubr.bf16.mxu1 %v2680_v47  ;;  %v2741_v39 = vld [vmem:[%s3450_s1 + $0x218] sm:$0xff]   ;;  %v2746_v43 = vld [vmem:[%s3451_s0 + $0xf0] ss:$56 sps:$4 sm:$0xff]  }
  0x26   :  { %2438 = vmatprep.subr.bf16.mxu1 %v2674_v42  ;;  %v2745_v42 = vld [vmem:[%s3450_s1 + $0x298] sm:$0xff]  }
  0x27   :  { %2399 = vmatpush3.bf16.msra.mxu0 %v2673_v41  ;;  %v2743_v41 = vld [vmem:[%s3451_s0 + $0xf4] ss:$56 sps:$4 sm:$0xff]   ;;  %v2751_v47 = vld [vmem:[%s3451_s0 + $0xf8] ss:$56 sps:$4 sm:$0xff]  }
  0x28   :  { %2400 = vmatprep.subr.bf16.mxu0 %v2679_v46  ;;  %v2750_v46 = vld [vmem:[%s3450_s1 + $0x220] sm:$0xff]  }
  0x29   :  { %2439 = vmatpush3.bf16.msra.mxu1 %v2677_v44  ;;  %v2747_v44 = vld [vmem:[%s3450_s1 + $0x260] sm:$0xff]  }
  0x2a   :  { %1268 = vmatmul.mubr.bf16.gmra.mrb[4].mxu0 %v2678_v45  ;;  %2440 = vmatprep.subr.bf16.mxu1 %v2684_v50  ;;  %v2748_v45 = vld [vmem:[%s3451_s0 + $0xfc] ss:$56 sps:$4 sm:$0xff]   ;;  %v2754_v50 = vld [vmem:[%s3450_s1 + $0x268] sm:$0xff]  }
  0x2b   :  { %2401 = vmatpush3.bf16.msra.mxu0 %v2682_v48  ;;  %1275 = vmatprep.mubr.bf16.mxu0 %v2689_v55  ;;  %v2752_v48 = vld [vmem:[%s3450_s1 + $0x2e0] sm:$0xff]   ;;  %v2758_v55 = vld [vmem:[%s3450_s1 + $0x2a8] sm:$0xff]  }
  0x2c   :  { %1332 = vmatmul.mubr.bf16.gmra.mrb[4].mxu1 %v2683_v49  ;;  %2402 = vmatprep.subr.bf16.mxu0 %v2686_v52  ;;  %v2753_v49 = vld [vmem:[%s3450_s1 + $0x2a0] sm:$0xff]   ;;  %v2756_v52 = vld [vmem:[%s3450_s1 + $0x2e8] sm:$0xff]  }
  0x2d   :  { %2441 = vmatpush3.bf16.msra.mxu1 %v2685_v51  ;;  %1339 = vmatprep.mubr.bf16.mxu1 %v2694_v59  ;;  %v2755_v51 = vld [vmem:[%s3450_s1 + $0x228] sm:$0xff]  }
  0x2e   :  { %2442 = vmatprep.subr.bf16.mxu1 %v2688_v54 }
  0x2f   :  { %2403 = vmatpush3.bf16.msra.mxu0 %v2687_v53  ;;  %v83_v53 = vld [vmem:[%s3451_s0 + $0x160] sm:$0xff] }
  0x30   :  { %2404 = vmatprep.subr.bf16.mxu0 %v2693_v58  ;;  %v2168_v54 = vcombine.high %v83_v53, %v83_v53  ;;  %v84_v58 = vld [vmem:[%s3451_s0 + $0x168] sm:$0xff] }
  0x31   :  { %2443 = vmatpush3.bf16.msra.mxu1 %v2691_v56  ;;  %v2167_v56 = vcombine.low %v83_v53, %v83_v53  ;;  %v2170_v59 = vcombine.high %v84_v58, %v84_v58 }
  0x32   :  { %1276 = vmatmul.mubr.bf16.gmra.mrb[8].mxu0 %v2692_v57  ;;  %2444 = vmatprep.subr.bf16.mxu1 %v2698_v62  ;;  %v2760_v57 = vld [vmem:[%s3450_s1 + $0x270] sm:$0xff]  }
  0x33   :  { %2405 = vmatpush3.bf16.msra.mxu0 %v2696_v60  ;;  %1283 = vmatprep.mubr.bf16.mxu0 %v2164_v4  ;;  %v2762_v60 = vld [vmem:[%s3450_s1 + $0x230] sm:$0xff]   ;;  %v2771_v4 = vld [vmem:[%s3451_s0 + $0x24] ss:$56 sps:$4 sm:$0xff]  }
  0x34   :  { %1340 = vmatmul.mubr.bf16.gmra.mrb[8].mxu1 %v2697_v61  ;;  %2406 = vmatprep.subr.bf16.mxu0 %v2700_v0  ;;  %v2169_v61 = vcombine.low %v84_v58, %v84_v58  ;;  %v2764_v62 = vld [vmem:[%s3450_s1 + $0x2f0] sm:$0xff]   ;;  %v2766_v0 = vld [vmem:[%s3450_s1 + $0x278] sm:$0xff]  }
  0x35   :  { %2445 = vmatpush3.bf16.msra.mxu1 %v2699_v63  ;;  %1347 = vmatprep.mubr.bf16.mxu1 %v2166_v9  ;;  %v2765_v63 = vld [vmem:[%s3450_s1 + $0x2b0] sm:$0xff]   ;;  %v2776_v9 = vld [vmem:[%s3450_s1 + $0x300] sm:$0xff]  }
  0x36   :  { %2446 = vmatprep.subr.bf16.mxu1 %v2702_v2  ;;  %v2768_v2 = vld [vmem:[%s3450_s1 + $0x2f8] sm:$0xff]  }
  0x37   :  { %2407 = vmatpush3.bf16.msra.mxu0 %v2701_v1  ;;  %v2767_v1 = vld [vmem:[%s3450_s1 + $0x238] sm:$0xff]  }
  0x38   :  { %2408 = vmatprep.subr.bf16.mxu0 %v2706_v7  ;;  %v2773_v7 = vld [vmem:[%s3451_s0 + $0x28] ss:$56 sps:$4 sm:$0xff]  }
  0x39   :  { %2447 = vmatpush3.bf16.msra.mxu1 %v2704_v5  ;;  %v2772_v5 = vld [vmem:[%s3450_s1 + $0x2b8] sm:$0xff]  }
  0x3a   :  { %1284 = vmatmul.mubr.bf16.gmra.mrb[12].mxu0 %v2163_v6  ;;  %2448 = vmatprep.subr.bf16.mxu1 %v2710_v12  ;;  %v2822_v6 = vmov 0   ;;  %v2780_v12 = vld [vmem:[%s3451_s0 + $0x90] ss:$56 sps:$4 sm:$0xff]  }
  0x3b   :  { %2409 = vmatpush3.bf16.msra.mxu0 %v2708_v10  ;;  %1387 = vmatprep.mubr.bf16.mxu0 %v2717_v18  ;;  %v2777_v10 = vld [vmem:[%s3450_s1 + $0x308] sm:$0xff]   ;;  %v2785_v18 = vld [vmem:[%s3450_s1 + $0x318] sm:$0xff]  }
  0x3c   :  { %1348 = vmatmul.mubr.bf16.gmra.mrb[12].mxu1 %v2165_v11  ;;  %2410 = vmatprep.subr.bf16.mxu0 %v2712_v14  ;;  %v2778_v11 = vld [vmem:[%s3451_s0 + $0x94] ss:$56 sps:$4 sm:$0xff]  }
  0x3d   :  { %2449 = vmatpush3.bf16.msra.mxu1 %v2711_v13  ;;  %1451 = vmatprep.mubr.bf16.mxu1 %v2722_v22  ;;  %v2781_v13 = vld [vmem:[%s3451_s0 + $0x9c] ss:$56 sps:$4 sm:$0xff]  }
  0x3e   :  { %2450 = vmatprep.subr.bf16.mxu1 %v2714_v16  ;;  %v2783_v14 = vld [vmem:[%s3450_s1 + $0x310] sm:$0xff]   ;;  %v2786_v16 = vld [vmem:[%s3451_s0 + $0x104] ss:$56 sps:$4 sm:$0xff]  }
  0x3f   :  { %2411 = vmatpush3.bf16.msra.mxu0 %v2713_v15  ;;  %v2784_v15 = vld [vmem:[%s3451_s0 + $0x98] ss:$56 sps:$4 sm:$0xff]  }
  0x40   :  { %2476 = vmatprep.subr.bf16.mxu0 %v2719_v20  ;;  %v2788_v20 = vld [vmem:[%s3451_s0 + $0x100] ss:$56 sps:$4 sm:$0xff]  }
  0x41   :  { %2451 = vmatpush3.bf16.msra.mxu1 %v2718_v19  ;;  %v85_v19 = vld [vmem:[%s3451_s0 + $0x170] sm:$0xff]  ;;  %v86_v22 = vld [vmem:[%s3451_s0 + $0x178] sm:$0xff] }
  0x42   :  { %1388 = vmatmul.mubr.bf16.vlgmr.msra.gmra.mrb[16].mxu0 %v2715_v17  ;;  %2516 = vmatprep.subr.bf16.mxu1 %v2724_v24  ;;  %v2789_v17 = vld [vmem:[%s3451_s0 + $0x10c] ss:$56 sps:$4 sm:$0xff]   ;;  %v2792_v24 = vld [vmem:[%s3451_s0 + $0x108] ss:$56 sps:$4 sm:$0xff]  }
  0x43   :  { %2477 = vmatpush3.bf16.msra.mxu0 %v2723_v23  ;;  %1395 = vmatprep.mubr.bf16.mxu0 %v2729_v29  ;;  %v2791_v23 = vld [vmem:[%s3450_s1 + $0x320] sm:$0xff]   ;;  %v2797_v29 = vld [vmem:[%s3450_s1 + $0x330] sm:$0xff]  }
  0x44   :  { %1452 = vmatmul.mubr.bf16.vlgmr.msra.gmra.mrb[16].mxu1 %v2720_v21  ;;  %2478 = vmatprep.subr.bf16.mxu0 %v2726_v26  ;;  %v2172_v21 = vcombine.high %v85_v19, %v85_v19  ;;  %v2793_v26 = vld [vmem:[%s3450_s1 + $0x328] sm:$0xff]  }
  0x45   :  { %2517 = vmatpush3.bf16.msra.mxu1 %v2725_v25  ;;  %1459 = vmatprep.mubr.bf16.mxu1 %v2734_v33  ;;  %v2174_v25 = vcombine.high %v86_v22, %v86_v22  ;;  %v2801_v33 = vld [vmem:[%s3450_s1 + $0x348] sm:$0xff]  }
  0x46   :  { %2518 = vmatprep.subr.bf16.mxu1 %v2728_v28  ;;  %v2806_v28 = vld [vmem:[%s3451_s0 + $0x34] ss:$56 sps:$4 sm:$0xff]  }
  0x47   :  { %2479 = vmatpush3.bf16.msra.mxu0 %v2727_v27  ;;  %v2171_v27 = vcombine.low %v85_v19, %v85_v19 }
  0x48   :  { %2480 = vmatprep.subr.bf16.mxu0 %v2733_v32  ;;  %v2800_v32 = vld [vmem:[%s3450_s1 + $0x340] sm:$0xff]  }
  0x49   :  { %2519 = vmatpush3.bf16.msra.mxu1 %v2731_v30  ;;  %v2173_v30 = vcombine.low %v86_v22, %v86_v22 }
  0x4a   :  { %1396 = vmatmul.mubr.bf16.gmra.mrb[20].mxu0 %v2732_v31  ;;  %2520 = vmatprep.subr.bf16.mxu1 %v2738_v36  ;;  %v2799_v31 = vld [vmem:[%s3450_s1 + $0x338] sm:$0xff]   ;;  %v2804_v36 = vld [vmem:[%s3451_s0 + $0x30] ss:$56 sps:$4 sm:$0xff]  }
  0x4b   :  { %2481 = vmatpush3.bf16.msra.mxu0 %v2736_v34  ;;  %1403 = vmatprep.mubr.bf16.mxu0 %v2743_v41  ;;  %v2802_v34 = vld [vmem:[%s3450_s1 + $0x350] sm:$0xff]  }
  0x4c   :  { %1460 = vmatmul.mubr.bf16.gmra.mrb[20].mxu1 %v2737_v35  ;;  %2482 = vmatprep.subr.bf16.mxu0 %v2740_v38  ;;  %v2803_v35 = vld [vmem:[%s3450_s1 + $0x358] sm:$0xff]   ;;  %v2812_v41 = vld [vmem:[%s3451_s0 + $0x110] ss:$56 sps:$4 sm:$0xff]  }
  0x4d   :  { %2521 = vmatpush3.bf16.msra.mxu1 %v2739_v37  ;;  %1467 = vmatprep.mubr.bf16.mxu1 %v2748_v45  ;;  %v2807_v37 = vld [vmem:[%s3451_s0 + $0xa4] ss:$56 sps:$4 sm:$0xff]   ;;  %v2809_v38 = vld [vmem:[%s3451_s0 + $0xa0] ss:$56 sps:$4 sm:$0xff]  }
  0x4e   :  { %2522 = vmatprep.subr.bf16.mxu1 %v2742_v40  ;;  %v87_v40 = vld [vmem:[%s3451_s0 + $0x180] sm:$0xff] }
  0x4f   :  { %2483 = vmatpush3.bf16.msra.mxu0 %v2741_v39  ;;  %v2810_v39 = vld [vmem:[%s3451_s0 + $0x114] ss:$56 sps:$4 sm:$0xff]  }
  0x50   :  { %2484 = vmatprep.subr.bf16.mxu0 %v2747_v44  ;;  %v2815_v44 = vld [vmem:[%s3452_s3] sm:$0xff]  }
  0x51   :  { %2523 = vmatpush3.bf16.msra.mxu1 %v2745_v42  ;;  %v2176_v42 = vcombine.high %v87_v40, %v87_v40 }
  0x52   :  { %1404 = vmatmul.mubr.bf16.gmra.mrb[24].mxu0 %v2746_v43  ;;  %2524 = vmatprep.subr.bf16.mxu1 %v2752_v48  ;;  %v2175_v43 = vcombine.low %v87_v40, %v87_v40 }
  0x53   :  { %2485 = vmatpush3.bf16.msra.mxu0 %v2750_v46  ;;  %1411 = vmatprep.mubr.bf16.mxu0 %v2168_v54  ;;  %v2120_v46 = vld [vmem:[%s3453_s2] ss:$0 sm:$0xff] }
  0x54   :  { %1468 = vmatmul.mubr.bf16.gmra.mrb[24].mxu1 %v2751_v47  ;;  %2486 = vmatprep.subr.bf16.mxu0 %v2754_v50 }
  0x55   :  { %2525 = vmatpush3.bf16.msra.mxu1 %v2753_v49  ;;  %1475 = vmatprep.mubr.bf16.mxu1 %v2170_v59 }
  0x56   :  { %2526 = vmatprep.subr.bf16.mxu1 %v2756_v52 }
  0x57   :  { %2487 = vmatpush3.bf16.msra.mxu0 %v2755_v51 }
  0x58   :  { %2488 = vmatprep.subr.bf16.mxu0 %v2760_v57 }
  0x59   :  { %2527 = vmatpush3.bf16.msra.mxu1 %v2758_v55 }
  0x5a   :  { %1412 = vmatmul.mubr.bf16.gmra.mrb[28].mxu0 %v2167_v56  ;;  %2528 = vmatprep.subr.bf16.mxu1 %v2764_v62  ;;  %v2816_v62 = vld [vmem:[%s3452_s3 + $0x8] sm:$0xff]  }
  0x5b   :  { %2489 = vmatpush3.bf16.msra.mxu0 %v2762_v60  ;;  %1515 = vmatprep.mubr.bf16.mxu0 %v2771_v4 }
  0x5c   :  { %1476 = vmatmul.mubr.bf16.gmra.mrb[28].mxu1 %v2169_v61  ;;  %2490 = vmatprep.subr.bf16.mxu0 %v2766_v0 }
  0x5d   :  { %2529 = vmatpush3.bf16.msra.mxu1 %v2765_v63  ;;  %1579 = vmatprep.mubr.bf16.mxu1 %v2775_v8 }
  0x5e   :  { %2530 = vmatprep.subr.bf16.mxu1 %v2768_v2 }
  0x5f   :  { %2491 = vmatpush3.bf16.msra.mxu0 %v2767_v1 }
  0x60   :  { %1611 = vmatprep.subr.bf16.mxu0 %v2822_v6 }
  0x61   :  { %2531 = vmatpush3.bf16.msra.mxu1 %v2772_v5 }
  0x62   :  { %1516 = vmatmul.mubr.bf16.vlgmr.msra.gmra.mrb[32].mxu0 %v2769_v3  ;;  %2579 = vmatprep.subr.bf16.mxu1 %v2815_v44 }
  0x63   :  { %1612 = vmatpush1.bf16.msra.mxu0 %v2776_v9  ;;  %1523 = vmatprep.mubr.bf16.mxu0 %v2778_v11 }
  0x64   :  { %1580 = vmatmul.mubr.bf16.vlgmr.msra.gmra.mrb[32].mxu1 %v2773_v7  ;;  %1613 = vmatprep.subr.bf16.mxu0 %v2822_v6 }
  0x65   :  { %1587 = vmatprep.mubr.bf16.mxu1 %v2781_v13  ;;  %2580 = vmatpush3.bf16.msra.mxu1 %v2815_v44 }
  0x66   :  { %2581 = vmatprep.subr.bf16.mxu1 %v2816_v62 }
  0x67   :  { %1614 = vmatpush1.bf16.msra.mxu0 %v2777_v10 }
  0x68   :  { %1615 = vmatprep.subr.bf16.mxu0 %v2822_v6 }
  0x69   :  { %2582 = vmatpush3.bf16.msra.mxu1 %v2816_v62 }
  0x6a   :  { %1524 = vmatmul.mubr.bf16.gmra.mrb[36].mxu0 %v2780_v12 }
  0x6b   :  { %1531 = vmatprep.mubr.bf16.mxu0 %v2786_v16  ;;  %1616 = vmatpush1.bf16.msra.mxu0 %v2783_v14 }
  0x6c   :  { %1588 = vmatmul.mubr.bf16.gmra.mrb[36].mxu1 %v2784_v15  ;;  %1617 = vmatprep.subr.bf16.mxu0 %v2822_v6 }
  0x6d   :  { %1595 = vmatprep.mubr.bf16.mxu1 %v2789_v17 }
  0x6f   :  { %1618 = vmatpush1.bf16.msra.mxu0 %v2785_v18 }
  0x70   :  { %1619 = vmatprep.subr.bf16.mxu0 %v2822_v6 }
  0x72   :  { %1532 = vmatmul.mubr.bf16.gmra.mrb[40].mxu0 %v2788_v20 }
  0x73   :  { %1539 = vmatprep.mubr.bf16.mxu0 %v2172_v21  ;;  %1620 = vmatpush1.bf16.msra.mxu0 %v2791_v23 }
  0x74   :  { %1596 = vmatmul.mubr.bf16.gmra.mrb[40].mxu1 %v2792_v24  ;;  %1621 = vmatprep.subr.bf16.mxu0 %v2822_v6 }
  0x75   :  { %1603 = vmatprep.mubr.bf16.mxu1 %v2174_v25 }
  0x77   :  { %1622 = vmatpush1.bf16.msra.mxu0 %v2793_v26 }
  0x78   :  { %1623 = vmatprep.subr.bf16.mxu0 %v2822_v6 }
  0x7a   :  { %1540 = vmatmul.mubr.bf16.gmra.mrb[44].mxu0 %v2171_v27 }
  0x7b   :  { %2285 = vmatprep.mubr.msk.bf16.mxu0 %vm1214_vm0, %v2806_v28  ;;  %1624 = vmatpush1.bf16.msra.mxu0 %v2797_v29 }
  0x7c   :  { %1604 = vmatmul.mubr.bf16.gmra.mrb[44].mxu1 %v2173_v30  ;;  %1625 = vmatprep.subr.bf16.mxu0 %v2822_v6 }
  0x7f   :  { %1626 = vmatpush1.bf16.msra.mxu0 %v2799_v31 }
  0x80   :  { %1627 = vmatprep.subr.bf16.mxu0 %v2822_v6 }
  0x83   :  { %1628 = vmatpush1.bf16.msra.mxu0 %v2800_v32 }
  0x84   :  { %1629 = vmatprep.subr.bf16.mxu0 %v2822_v6 }
  0x87   :  { %1630 = vmatpush1.bf16.msra.mxu0 %v2801_v33 }
  0x88   :  { %1631 = vmatprep.subr.bf16.mxu0 %v2822_v6 }
  0x8b   :  { %1632 = vmatpush1.bf16.msra.mxu0 %v2802_v34 }
  0x8c   :  { %1633 = vmatprep.subr.bf16.mxu0 %v2822_v6 }
  0x8f   :  { %1634 = vmatpush1.bf16.msra.mxu0 %v2803_v35 }
  0x92   :  { %1644 = vmatmul.mubr.bf16.vlgmr.msra.gmra.mrb[48].mxu0 %v2804_v36 }
  0x93   :  { %2286 = vmatprep.mubr.msk.bf16.mxu0 %vm1214_vm0, %v2807_v37 }
  0x9a   :  { %1652 = vmatmul.mubr.bf16.gmra.mrb[52].mxu0 %v2809_v38 }
  0x9b   :  { %2287 = vmatprep.mubr.msk.bf16.mxu0 %vm1214_vm0, %v2810_v39 }
  0xa2   :  { %1660 = vmatmul.mubr.bf16.gmra.mrb[56].mxu0 %v2812_v41 }
  0xa3   :  { %2288 = vmatprep.mubr.msk.bf16.mxu0 %vm1214_vm0, %v2176_v42 }
  0xaa   :  { %1668 = vmatmul.mubr.bf16.gmra.mrb[60].mxu0 %v2175_v43 }
  0xf5   :  { %v2332_v45 = vpop.f32.mrb[0].mxu0 }
  0xf6   :  { %v2333_v47 = vpop.f32.mrb[1].mxu0 }
  0xf7   :  { %v2334_v48 = vadd.f32 %v2333_v47, %v2332_v45  ;;  %v2335_v49 = vpop.f32.mrb[2].mxu0  ;;  %v2372_v50 = vpop.f32.mrb[0].mxu1 }
  0xf8   :  { %v2336_v51 = vpop.f32.mrb[3].mxu0  ;;  %v2373_v54 = vpop.f32.mrb[1].mxu1 }
  0xf9   :  { %v1262_v52 = vadd.f32 %v2334_v48, %v2120_v46  ;;  %v2337_v53 = vadd.f32 %v2336_v51, %v2335_v49  ;;  %v2374_v55 = vadd.f32 %v2373_v54, %v2372_v50  ;;  %v2375_v56 = vpop.f32.mrb[2].mxu1 }
  0xfa   :  { %v2376_v58 = vpop.f32.mrb[3].mxu1 }
  0xfb   :  { %v1265_v57 = vadd.f32 %v2337_v53, %v2120_v46  ;;  %v1326_v59 = vadd.f32 %v2374_v55, %v1262_v52  ;;  %v2377_v60 = vadd.f32 %v2376_v58, %v2375_v56 }
  0xfd   :  { %v1329_v61 = vadd.f32 %v2377_v60, %v1265_v57  ;;  %v2338_v63 = vpop.f32.mrb[4].mxu0 }
  0xfe   :  { %v2339_v0 = vpop.f32.mrb[5].mxu0 }
  0xff   :  { %v2340_v1 = vadd.f32 %v2339_v0, %v2338_v63  ;;  %v2341_v2 = vpop.f32.mrb[6].mxu0  ;;  %v2378_v5 = vpop.f32.mrb[4].mxu1 }
 0x100   :  { %v2342_v3 = vpop.f32.mrb[7].mxu0  ;;  %v2379_v7 = vpop.f32.mrb[5].mxu1 }
 0x101   :  { %v1270_v4 = vadd.f32 %v2340_v1, %v2120_v46  ;;  %v2343_v6 = vadd.f32 %v2342_v3, %v2341_v2  ;;  %v2380_v9 = vadd.f32 %v2379_v7, %v2378_v5  ;;  %v2381_v10 = vpop.f32.mrb[6].mxu1 }
 0x102   :  { %v2382_v11 = vpop.f32.mrb[7].mxu1 }
 0x103   :  { %v1273_v8 = vadd.f32 %v2343_v6, %v2120_v46  ;;  %v1334_v12 = vadd.f32 %v2380_v9, %v1270_v4  ;;  %v2383_v13 = vadd.f32 %v2382_v11, %v2381_v10 }
 0x105   :  { %v1337_v14 = vadd.f32 %v2383_v13, %v1273_v8  ;;  %v2344_v15 = vpop.f32.mrb[8].mxu0 }
 0x106   :  { %v2345_v16 = vpop.f32.mrb[9].mxu0 }
 0x107   :  { %v2346_v17 = vadd.f32 %v2345_v16, %v2344_v15  ;;  %v2347_v18 = vpop.f32.mrb[10].mxu0  ;;  %v2384_v19 = vpop.f32.mrb[8].mxu1 }
 0x108   :  { %v2348_v20 = vpop.f32.mrb[11].mxu0  ;;  %v2385_v23 = vpop.f32.mrb[9].mxu1 }
 0x109   :  { %v1278_v21 = vadd.f32 %v2346_v17, %v2120_v46  ;;  %v2349_v22 = vadd.f32 %v2348_v20, %v2347_v18  ;;  %v2386_v24 = vadd.f32 %v2385_v23, %v2384_v19  ;;  %v2387_v25 = vpop.f32.mrb[10].mxu1 }
 0x10a   :  { %v2388_v27 = vpop.f32.mrb[11].mxu1 }
 0x10b   :  { %v1281_v26 = vadd.f32 %v2349_v22, %v2120_v46  ;;  %v1342_v28 = vadd.f32 %v2386_v24, %v1278_v21  ;;  %v2389_v29 = vadd.f32 %v2388_v27, %v2387_v25 }
 0x10d   :  { %v1345_v30 = vadd.f32 %v2389_v29, %v1281_v26  ;;  %v2350_v31 = vpop.f32.mrb[12].mxu0 }
 0x10e   :  { %v2351_v32 = vpop.f32.mrb[13].mxu0 }
 0x10f   :  { %v2352_v33 = vadd.f32 %v2351_v32, %v2350_v31  ;;  %v2353_v34 = vpop.f32.mrb[14].mxu0  ;;  %v2390_v35 = vpop.f32.mrb[12].mxu1 }
 0x110   :  { %v2354_v36 = vpop.f32.mrb[15].mxu0  ;;  %v2391_v37 = vpop.f32.mrb[13].mxu1 }
 0x111   :  { %v1286_v38 = vadd.f32 %v2352_v33, %v2120_v46  ;;  %v2392_v39 = vadd.f32 %v2391_v37, %v2390_v35  ;;  %v2393_v40 = vpop.f32.mrb[14].mxu1 }
 0x112   :  { %v2394_v41 = vpop.f32.mrb[15].mxu1 }
 0x113   :  { %v1350_v42 = vadd.f32 %v2392_v39, %v1286_v38 }
 0x115   :  { %v2412_v43 = vpop.f32.mrb[16].mxu0 }
 0x116   :  { %v2413_v44 = vpop.f32.mrb[17].mxu0 }
 0x117   :  { %v2414_v45 = vadd.f32 %v2413_v44, %v2412_v43  ;;  %v2415_v47 = vpop.f32.mrb[18].mxu0  ;;  %v2452_v50 = vpop.f32.mrb[16].mxu1 }
 0x118   :  { %v2416_v48 = vpop.f32.mrb[19].mxu0  ;;  %v2453_v52 = vpop.f32.mrb[17].mxu1 }
 0x119   :  { %v1390_v49 = vadd.f32 %v2414_v45, %v1326_v59  ;;  %v2417_v51 = vadd.f32 %v2416_v48, %v2415_v47  ;;  %v2454_v54 = vadd.f32 %v2453_v52, %v2452_v50  ;;  %v2455_v55 = vpop.f32.mrb[18].mxu1 }
 0x11a   :  { %v2456_v56 = vpop.f32.mrb[19].mxu1 }
 0x11b   :  { %v1393_v53 = vadd.f32 %v2417_v51, %v1329_v61  ;;  %v1454_v57 = vadd.f32 %v2454_v54, %v1390_v49  ;;  %v2457_v58 = vadd.f32 %v2456_v56, %v2455_v55 }
 0x11d   :  { %v1457_v46 = vadd.f32 %v2457_v58, %v1393_v53  ;;  %v2418_v60 = vpop.f32.mrb[20].mxu0 }
 0x11e   :  { %v2419_v62 = vpop.f32.mrb[21].mxu0 }
 0x11f   :  { %v2420_v63 = vadd.f32 %v2419_v62, %v2418_v60  ;;  %v2421_v0 = vpop.f32.mrb[22].mxu0  ;;  %v2458_v1 = vpop.f32.mrb[20].mxu1 }
 0x120   :  { %v2422_v2 = vpop.f32.mrb[23].mxu0  ;;  %v2459_v5 = vpop.f32.mrb[21].mxu1 }
 0x121   :  { %v1398_v3 = vadd.f32 %v2420_v63, %v1334_v12  ;;  %v2423_v4 = vadd.f32 %v2422_v2, %v2421_v0  ;;  %v2460_v59 = vadd.f32 %v2459_v5, %v2458_v1  ;;  %v2461_v6 = vpop.f32.mrb[22].mxu1 }
 0x122   :  { %v2462_v8 = vpop.f32.mrb[23].mxu1 }
 0x123   :  { %v1401_v7 = vadd.f32 %v2423_v4, %v1337_v14  ;;  %v1462_v61 = vadd.f32 %v2460_v59, %v1398_v3  ;;  %v2463_v9 = vadd.f32 %v2462_v8, %v2461_v6 }
 0x125   :  { %v1465_v10 = vadd.f32 %v2463_v9, %v1401_v7  ;;  %v2424_v11 = vpop.f32.mrb[24].mxu0 }
 0x126   :  { %v2425_v13 = vpop.f32.mrb[25].mxu0 }
 0x127   :  { %v2426_v15 = vadd.f32 %v2425_v13, %v2424_v11  ;;  %v2427_v16 = vpop.f32.mrb[26].mxu0  ;;  %v2464_v17 = vpop.f32.mrb[24].mxu1 }
 0x128   :  { %v2428_v18 = vpop.f32.mrb[27].mxu0  ;;  %v2465_v21 = vpop.f32.mrb[25].mxu1 }
 0x129   :  { %v1406_v19 = vadd.f32 %v2426_v15, %v1342_v28  ;;  %v2429_v20 = vadd.f32 %v2428_v18, %v2427_v16  ;;  %v2466_v22 = vadd.f32 %v2465_v21, %v2464_v17  ;;  %v2467_v12 = vpop.f32.mrb[26].mxu1 }
 0x12a   :  { %v2468_v24 = vpop.f32.mrb[27].mxu1 }
 0x12b   :  { %v1409_v23 = vadd.f32 %v2429_v20, %v1345_v30  ;;  %v1470_v25 = vadd.f32 %v2466_v22, %v1406_v19  ;;  %v2469_v26 = vadd.f32 %v2468_v24, %v2467_v12 }
 0x12d   :  { %v1473_v14 = vadd.f32 %v2469_v26, %v1409_v23  ;;  %v2430_v27 = vpop.f32.mrb[28].mxu0 }
 0x12e   :  { %v2431_v29 = vpop.f32.mrb[29].mxu0 }
 0x12f   :  { %v2432_v31 = vadd.f32 %v2431_v29, %v2430_v27  ;;  %v2433_v32 = vpop.f32.mrb[30].mxu0  ;;  %v2470_v33 = vpop.f32.mrb[28].mxu1 }
 0x130   :  { %v2434_v34 = vpop.f32.mrb[31].mxu0  ;;  %v2471_v36 = vpop.f32.mrb[29].mxu1 }
 0x131   :  { %v1414_v35 = vadd.f32 %v2432_v31, %v1350_v42  ;;  %v2472_v37 = vadd.f32 %v2471_v36, %v2470_v33  ;;  %v2473_v38 = vpop.f32.mrb[30].mxu1 }
 0x132   :  { %v2474_v28 = vpop.f32.mrb[31].mxu1 }
 0x133   :  { %v1478_v39 = vadd.f32 %v2472_v37, %v1414_v35 }
 0x135   :  { %v2492_v40 = vpop.f32.mrb[32].mxu0 }
 0x136   :  { %v2493_v41 = vpop.f32.mrb[33].mxu0 }
 0x137   :  { %v2494_v43 = vadd.f32 %v2493_v41, %v2492_v40  ;;  %v2495_v30 = vpop.f32.mrb[34].mxu0  ;;  %v2532_v44 = vpop.f32.mrb[32].mxu1 }
 0x138   :  { %v2496_v45 = vpop.f32.mrb[35].mxu0  ;;  %v2533_v49 = vpop.f32.mrb[33].mxu1 }
 0x139   :  { %v1518_v47 = vadd.f32 %v2494_v43, %v1454_v57  ;;  %v2497_v48 = vadd.f32 %v2496_v45, %v2495_v30  ;;  %v2534_v50 = vadd.f32 %v2533_v49, %v2532_v44  ;;  %v2535_v51 = vpop.f32.mrb[34].mxu1 }
 0x13a   :  { %v2536_v53 = vpop.f32.mrb[35].mxu1 }
 0x13b   :  { %v1521_v52 = vadd.f32 %v2497_v48, %v1457_v46  ;;  %v2537_v54 = vadd.f32 %v2536_v53, %v2535_v51  ;;  %v1582_v42 = vadd.f32 %v2534_v50, %v1518_v47 }
 0x13d   :  { %v2498_v55 = vpop.f32.mrb[36].mxu0  ;;  %v1585_v58 = vadd.f32 %v2537_v54, %v1521_v52 }
 0x13e   :  { %v2499_v56 = vpop.f32.mrb[37].mxu0 }
 0x13f   :  { %v2500_v60 = vadd.f32 %v2499_v56, %v2498_v55  ;;  %v2501_v62 = vpop.f32.mrb[38].mxu0  ;;  %v2538_v63 = vpop.f32.mrb[36].mxu1 }
 0x140   :  { %v2502_v0 = vpop.f32.mrb[39].mxu0  ;;  %v2539_v3 = vpop.f32.mrb[37].mxu1 }
 0x141   :  { %v1526_v1 = vadd.f32 %v2500_v60, %v1462_v61  ;;  %v2503_v2 = vadd.f32 %v2502_v0, %v2501_v62  ;;  %v2540_v4 = vadd.f32 %v2539_v3, %v2538_v63  ;;  %v2541_v57 = vpop.f32.mrb[38].mxu1 }
 0x142   :  { %v2542_v59 = vpop.f32.mrb[39].mxu1 }
 0x143   :  { %v1529_v5 = vadd.f32 %v2503_v2, %v1465_v10  ;;  %v2543_v6 = vadd.f32 %v2542_v59, %v2541_v57  ;;  %v1590_v7 = vadd.f32 %v2540_v4, %v1526_v1 }
 0x145   :  { %v2504_v46 = vpop.f32.mrb[40].mxu0  ;;  %v1593_v9 = vadd.f32 %v2543_v6, %v1529_v5 }
 0x146   :  { %v2505_v8 = vpop.f32.mrb[41].mxu0 }
 0x147   :  { %v2506_v11 = vadd.f32 %v2505_v8, %v2504_v46  ;;  %v2507_v13 = vpop.f32.mrb[42].mxu0  ;;  %v2544_v15 = vpop.f32.mrb[40].mxu1  ;;  %v2818_v46 = vld [vmem:[%s3454_s5 + $0x8] sm:$0xff]   ;;  %v2289_v8 = vld [vmem:[%s3455_s4] ss:$0 sm:$0xff] }
 0x148   :  { %v2508_v16 = vpop.f32.mrb[43].mxu0  ;;  %v2545_v19 = vpop.f32.mrb[41].mxu1 }
 0x149   :  { %v1534_v17 = vadd.f32 %v2506_v11, %v1470_v25  ;;  %v2509_v18 = vadd.f32 %v2508_v16, %v2507_v13  ;;  %v2546_v20 = vadd.f32 %v2545_v19, %v2544_v15  ;;  %v2547_v61 = vpop.f32.mrb[42].mxu1 }
 0x14a   :  { %v2548_v22 = vpop.f32.mrb[43].mxu1 }
 0x14b   :  { %v1537_v21 = vadd.f32 %v2509_v18, %v1473_v14  ;;  %v2549_v12 = vadd.f32 %v2548_v22, %v2547_v61  ;;  %v1598_v23 = vadd.f32 %v2546_v20, %v1534_v17 }
 0x14d   :  { %v2510_v10 = vpop.f32.mrb[44].mxu0  ;;  %v1601_v26 = vadd.f32 %v2549_v12, %v1537_v21 }
 0x14e   :  { %v2511_v24 = vpop.f32.mrb[45].mxu0 }
 0x14f   :  { %v2512_v27 = vadd.f32 %v2511_v24, %v2510_v10  ;;  %v2513_v29 = vpop.f32.mrb[46].mxu0  ;;  %v2550_v31 = vpop.f32.mrb[44].mxu1 }
 0x150   :  { %v2514_v32 = vpop.f32.mrb[47].mxu0  ;;  %v2551_v34 = vpop.f32.mrb[45].mxu1 }
 0x151   :  { %v1542_v33 = vadd.f32 %v2512_v27, %v1478_v39  ;;  %v2552_v35 = vadd.f32 %v2551_v34, %v2550_v31  ;;  %v2553_v36 = vpop.f32.mrb[46].mxu1 }
 0x152   :  { %v2554_v25 = vpop.f32.mrb[47].mxu1 }
 0x153   :  { %v1606_v37 = vadd.f32 %v2552_v35, %v1542_v33 }
 0x165   :  { %v1645_v38 = vpop.f32.mrb[48].mxu0 }
 0x166   :  { %v1646_v28 = vadd.f32 %v1645_v38, %v1582_v42  ;;  %v1647_v40 = vpop.f32.mrb[49].mxu0  ;;  %v2820_v38 = vld [vmem:[%s3457_s9] sm:$0xff]  }
 0x167   :  { %v1648_v14 = vpop.f32.mrb[50].mxu0  ;;  %2613 = vmatprep.subr.bf16.mxu0 %v2820_v38 }
 0x168   :  { %v1649_v41 = vadd.f32 %v1648_v14, %v1585_v58  ;;  %v1650_v43 = vpop.f32.mrb[51].mxu0  ;;  %v1675_v30 = vmax.f32 %v1646_v28, 0.0  ;;  %2614 = vmatpush3.bf16.msra.mxu0 %v2820_v38  ;;  %v2296_v28 = vld [vmem:[%s3458_s6] ss:$0 sm:$0xff] }
 0x16a   :  { %v1676_v44 = vmax.f32 %v1649_v41, 0.0 }
 0x16c   :  { %v1687_v45 = vpack.c.bf16 %v1676_v44, %v1675_v30 }
 0x16d   :  { %v1653_v47 = vpop.f32.mrb[52].mxu0 }
 0x16e   :  { %v1654_v48 = vadd.f32 %v1653_v47, %v1590_v7  ;;  %v1655_v49 = vpop.f32.mrb[53].mxu0  ;;  %2583 = vmatprep.mubr.msk.bf16.mxu1 %vm1709_vm1, %v1687_v45  ;;  %v2817_v7 = vld [vmem:[%s3454_s5] sm:$0xff]  }
 0x16f   :  { %v1656_v39 = vpop.f32.mrb[54].mxu0  ;;  %2591 = vmatprep.subr.bf16.mxu1 %v2817_v7 }
 0x170   :  { %v1657_v50 = vadd.f32 %v1656_v39, %v1593_v9  ;;  %v1658_v51 = vpop.f32.mrb[55].mxu0  ;;  %v1677_v52 = vmax.f32 %v1654_v48, 0.0 }
 0x172   :  { %v1678_v53 = vmax.f32 %v1657_v50, 0.0 }
 0x174   :  { %v1688_v54 = vpack.c.bf16 %v1678_v53, %v1677_v52 }
 0x175   :  { %v1661_v42 = vpop.f32.mrb[56].mxu0 }
 0x176   :  { %v1662_v55 = vadd.f32 %v1661_v42, %v1598_v23  ;;  %v1663_v56 = vpop.f32.mrb[57].mxu0  ;;  %2584 = vmatmul.mubr.msk.bf16.vlgmr.msra.gmra.mrb[48].mxu1 %vm1709_vm1, %v1688_v54 }
 0x177   :  { %v1664_v58 = vpop.f32.mrb[58].mxu0  ;;  %2592 = vmatpush3.bf16.msra.mxu1 %v2817_v7 }
 0x178   :  { %v1665_v60 = vadd.f32 %v1664_v58, %v1601_v26  ;;  %v1666_v62 = vpop.f32.mrb[59].mxu0  ;;  %v1679_v63 = vmax.f32 %v1662_v55, 0.0  ;;  %2593 = vmatprep.subr.bf16.mxu1 %v2818_v46 }
 0x17a   :  { %v1680_v0 = vmax.f32 %v1665_v60, 0.0 }
 0x17b   :  { %2594 = vmatpush3.bf16.msra.mxu1 %v2818_v46 }
 0x17c   :  { %v1689_v1 = vpack.c.bf16 %v1680_v0, %v1679_v63 }
 0x17d   :  { %v1669_v2 = vpop.f32.mrb[60].mxu0 }
 0x17e   :  { %v1670_v3 = vadd.f32 %v1669_v2, %v1606_v37  ;;  %v1671_v4 = vpop.f32.mrb[61].mxu0  ;;  %2587 = vmatprep.mubr.msk.bf16.mxu1 %vm1709_vm1, %v1689_v1  ;;  %v2819_v37 = vld [vmem:[%s3456_s7] sm:$0xff]  }
 0x17f   :  { %v1672_v57 = vpop.f32.mrb[62].mxu0  ;;  %2603 = vmatprep.subr.bf16.mxu1 %v2819_v37  ;;  %v2303_v4 = vld [vmem:[%s3459_s8] ss:$0 sm:$0xff] }
 0x180   :  { %v1681_v5 = vmax.f32 %v1670_v3, 0.0  ;;  %v1673_v59 = vpop.f32.mrb[63].mxu0  ;;  %v2821_v3 = vld [vmem:[%s3457_s9 + $0x8] sm:$0xff]  }
 0x181   :  { %2615 = vmatprep.subr.bf16.mxu0 %v2821_v3 }
 0x182   :  { %v1690_v6 = vpack.c.bf16 %v1681_v5, %v1681_v5  ;;  %2616 = vmatpush3.bf16.msra.mxu0 %v2821_v3 }
 0x184   :  { %2588 = vmatmul.mubr.msk.bf16.gmra.mrb[52].mxu1 %vm1709_vm1, %v1690_v6 }
 0x249   :  { %v2585_v9 = vpop.f32.mrb[48].mxu1 }
 0x24a   :  { %v1765_v11 = vadd.f32 %v2585_v9, %v2289_v8  ;;  %v1756_v13 = vpop.f32.mrb[49].mxu1 }
 0x24b   :  { %v1757_v15 = vadd.f32 %v2289_v8, %v1756_v13  ;;  %v2586_v16 = vpop.f32.mrb[50].mxu1 }
 0x24c   :  { %v1768_v17 = vadd.f32 %v2586_v16, %v2289_v8  ;;  %v1759_v18 = vpop.f32.mrb[51].mxu1  ;;  %v1788_v20 = vmax.f32 %v1765_v11, 0.0 }
 0x24d   :  { %v1760_v19 = vadd.f32 %v2289_v8, %v1759_v18  ;;  %v1786_v21 = vmax.f32 %v1757_v15, 0.0 }
 0x24e   :  { %v1789_v61 = vmax.f32 %v1768_v17, 0.0 }
 0x24f   :  { %v1787_v22 = vmax.f32 %v1760_v19, 0.0 }
 0x250   :  { %v1799_v12 = vpack.c.bf16 %v1789_v61, %v1788_v20 }
 0x251   :  { %v1798_v23 = vpack.c.bf16 %v1787_v22, %v1786_v21 }
 0x253   :  { %2595 = vmatprep.mubr.msk.bf16.mxu1 %vm1709_vm1, %v1798_v23 }
 0x254   :  { %2596 = vmatmul.mubr.msk.bf16.vlgmr.msra.gmra.mrb[56].mxu1 %vm1709_vm1, %v1799_v12 }
 0x255   :  { %2604 = vmatpush3.bf16.msra.mxu1 %v2819_v37 }
 0x256   :  { %2625 = vmatprep.subr.bf16.mxu1 %v2820_v38 }
 0x257   :  { %v2589_v10 = vpop.f32.mrb[52].mxu1 }
 0x258   :  { %v1781_v24 = vadd.f32 %v2589_v10, %v2289_v8  ;;  %v1772_v26 = vpop.f32.mrb[53].mxu1 }
 0x259   :  { %v1773_v27 = vadd.f32 %v2289_v8, %v1772_v26  ;;  %v2590_v29 = vpop.f32.mrb[54].mxu1 }
 0x25a   :  { %v1775_v31 = vpop.f32.mrb[55].mxu1  ;;  %v1792_v33 = vmax.f32 %v1781_v24, 0.0 }
 0x25b   :  { %v1776_v32 = vadd.f32 %v2289_v8, %v1775_v31  ;;  %v1790_v34 = vmax.f32 %v1773_v27, 0.0  ;;  %v2309_v31 = vld [vmem:[%s3460_s10] ss:$0 sm:$0xff] }
 0x25c   :  { %v1801_v25 = vpack.c.bf16 %v1792_v33, %v1792_v33 }
 0x25d   :  { %v1791_v35 = vmax.f32 %v1776_v32, 0.0 }
 0x25f   :  { %v1800_v36 = vpack.c.bf16 %v1791_v35, %v1790_v34 }
 0x261   :  { %2599 = vmatprep.mubr.msk.bf16.mxu1 %vm1709_vm1, %v1800_v36 }
 0x262   :  { %2600 = vmatmul.mubr.msk.bf16.gmra.mrb[60].mxu1 %vm1709_vm1, %v1801_v25 }
 0x327   :  { %v2597_v40 = vpop.f32.mrb[56].mxu1 }
 0x328   :  { %v1875_v14 = vadd.f32 %v2597_v40, %v2296_v28  ;;  %v1866_v41 = vpop.f32.mrb[57].mxu1 }
 0x329   :  { %v1867_v43 = vadd.f32 %v2296_v28, %v1866_v41  ;;  %v2598_v30 = vpop.f32.mrb[58].mxu1 }
 0x32a   :  { %v1878_v44 = vadd.f32 %v2598_v30, %v2296_v28  ;;  %v1869_v45 = vpop.f32.mrb[59].mxu1  ;;  %v1898_v48 = vmax.f32 %v1875_v14, 0.0 }
 0x32b   :  { %v1870_v47 = vadd.f32 %v2296_v28, %v1869_v45  ;;  %v1896_v39 = vmax.f32 %v1867_v43, 0.0 }
 0x32c   :  { %v1899_v49 = vmax.f32 %v1878_v44, 0.0 }
 0x32d   :  { %v1897_v50 = vmax.f32 %v1870_v47, 0.0 }
 0x32e   :  { %v1907_v51 = vpack.c.bf16 %v1899_v49, %v1898_v48 }
 0x32f   :  { %v1906_v52 = vpack.c.bf16 %v1897_v50, %v1896_v39 }
 0x331   :  { %2605 = vmatprep.mubr.msk.bf16.mxu1 %vm1922_vm2, %v1906_v52 }
 0x332   :  { %2606 = vmatmul.mubr.msk.bf16.vlgmr.msra.gmra.mrb[64].mxu1 %vm1922_vm2, %v1907_v51 }
 0x333   :  { %2627 = vmatpush3.bf16.msra.mxu1 %v2820_v38 }
 0x334   :  { %2626 = vmatprep.subr.bf16.mxu1 %v2821_v3 }
 0x335   :  { %v2601_v53 = vpop.f32.mrb[60].mxu1 }
 0x336   :  { %v1891_v54 = vadd.f32 %v2601_v53, %v2296_v28  ;;  %v1882_v42 = vpop.f32.mrb[61].mxu1 }
 0x337   :  { %v1883_v55 = vadd.f32 %v2296_v28, %v1882_v42  ;;  %v2602_v56 = vpop.f32.mrb[62].mxu1  ;;  %2628 = vmatpush3.bf16.msra.mxu1 %v2821_v3 }
 0x338   :  { %v1885_v58 = vpop.f32.mrb[63].mxu1  ;;  %v1902_v62 = vmax.f32 %v1891_v54, 0.0 }
 0x339   :  { %v1886_v60 = vadd.f32 %v2296_v28, %v1885_v58  ;;  %v1900_v63 = vmax.f32 %v1883_v55, 0.0 }
 0x33a   :  { %v1909_v2 = vpack.c.bf16 %v1902_v62, %v1902_v62 }
 0x33b   :  { %v1901_v0 = vmax.f32 %v1886_v60, 0.0 }
 0x33d   :  { %v1908_v1 = vpack.c.bf16 %v1901_v0, %v1900_v63 }
 0x33f   :  { %2609 = vmatprep.mubr.msk.bf16.mxu1 %vm1922_vm2, %v1908_v1 }
 0x340   :  { %2610 = vmatmul.mubr.msk.bf16.gmra.mrb[68].mxu1 %vm1922_vm2, %v1909_v2 }
 0x405   :  { %v2607_v57 = vpop.f32.mrb[64].mxu1 }
 0x406   :  { %v1978_v5 = vadd.f32 %v2607_v57, %v2303_v4  ;;  %v1969_v59 = vpop.f32.mrb[65].mxu1 }
 0x407   :  { %v1970_v6 = vadd.f32 %v2303_v4, %v1969_v59  ;;  %v2608_v7 = vpop.f32.mrb[66].mxu1 }
 0x408   :  { %v1981_v46 = vadd.f32 %v2608_v7, %v2303_v4  ;;  %v1972_v8 = vpop.f32.mrb[67].mxu1  ;;  %v2001_v11 = vmax.f32 %v1978_v5, 0.0 }
 0x409   :  { %v1973_v9 = vadd.f32 %v2303_v4, %v1972_v8  ;;  %v1999_v15 = vmax.f32 %v1970_v6, 0.0 }
 0x40a   :  { %v2002_v13 = vmax.f32 %v1981_v46, 0.0 }
 0x40b   :  { %v2000_v16 = vmax.f32 %v1973_v9, 0.0 }
 0x40c   :  { %v2012_v17 = vpack.c.bf16 %v2002_v13, %v2001_v11 }
 0x40d   :  { %v2011_v18 = vpack.c.bf16 %v2000_v16, %v1999_v15 }
 0x40f   :  { %2617 = vmatprep.mubr.msk.bf16.mxu0 %vm1709_vm1, %v2011_v18 }
 0x410   :  { %2618 = vmatmul.mubr.msk.bf16.vlgmr.msra.gmra.mrb[64].mxu0 %vm1709_vm1, %v2012_v17 }
 0x413   :  { %v2611_v19 = vpop.f32.mrb[68].mxu1 }
 0x414   :  { %v1994_v20 = vadd.f32 %v2611_v19, %v2303_v4  ;;  %v1985_v61 = vpop.f32.mrb[69].mxu1 }
 0x415   :  { %v1986_v21 = vadd.f32 %v2303_v4, %v1985_v61  ;;  %v2612_v22 = vpop.f32.mrb[70].mxu1 }
 0x416   :  { %v1988_v12 = vpop.f32.mrb[71].mxu1  ;;  %v2005_v10 = vmax.f32 %v1994_v20, 0.0 }
 0x417   :  { %v1989_v23 = vadd.f32 %v2303_v4, %v1988_v12  ;;  %v2003_v24 = vmax.f32 %v1986_v21, 0.0 }
 0x418   :  { %v2014_v29 = vpack.c.bf16 %v2005_v10, %v2005_v10 }
 0x419   :  { %v2004_v26 = vmax.f32 %v1989_v23, 0.0 }
 0x41b   :  { %v2013_v27 = vpack.c.bf16 %v2004_v26, %v2003_v24 }
 0x41d   :  { %2621 = vmatprep.mubr.msk.bf16.mxu1 %vm1709_vm1, %v2013_v27 }
 0x41e   :  { %2622 = vmatmul.mubr.msk.bf16.vlgmr.msra.gmra.mrb[72].mxu1 %vm1709_vm1, %v2014_v29 }
 0x4e3   :  { %v2619_v32 = vpop.f32.mrb[64].mxu0 }
 0x4e4   :  { %v2088_v33 = vadd.f32 %v2619_v32, %v2309_v31  ;;  %v2079_v34 = vpop.f32.mrb[65].mxu0 }
 0x4e5   :  { %v2080_v35 = vadd.f32 %v2309_v31, %v2079_v34  ;;  %v2620_v36 = vpop.f32.mrb[66].mxu0 }
 0x4e6   :  { %2111 = vst.msk [vmem:[%s3461_s11 + $0x10] sm:$0xff] %vm1922_vm2, %v2088_v33  ;;  %v2091_v25 = vadd.f32 %v2620_v36, %v2309_v31  ;;  %v2082_v37 = vpop.f32.mrb[67].mxu0 }
 0x4e7   :  { %2109 = vst.msk [vmem:[%s3461_s11] sm:$0xff] %vm1922_vm2, %v2080_v35  ;;  %v2083_v38 = vadd.f32 %v2309_v31, %v2082_v37 }
 0x4e8   :  { %2112 = vst.msk [vmem:[%s3461_s11 + $0x18] sm:$0xff] %vm1922_vm2, %v2091_v25 }
 0x4e9   :  { %2110 = vst.msk [vmem:[%s3461_s11 + $0x8] sm:$0xff] %vm1922_vm2, %v2083_v38 }
 0x4f1   :  { %v2623_v28 = vpop.f32.mrb[72].mxu1 }
 0x4f2   :  { %v2104_v40 = vadd.f32 %v2623_v28, %v2309_v31  ;;  %v2095_v14 = vpop.f32.mrb[73].mxu1 }
 0x4f3   :  { %v2096_v41 = vadd.f32 %v2309_v31, %v2095_v14  ;;  %v2624_v43 = vpop.f32.mrb[74].mxu1 }
 0x4f4   :  { %2115 = vst.msk [vmem:[%s3461_s11 + $0x30] sm:$0xff] %vm1922_vm2, %v2104_v40  ;;  %v2098_v30 = vpop.f32.mrb[75].mxu1 }
 0x4f5   :  { %2113 = vst.msk [vmem:[%s3461_s11 + $0x20] sm:$0xff] %vm1922_vm2, %v2096_v41  ;;  %v2099_v44 = vadd.f32 %v2309_v31, %v2098_v30 }
 0x4f7   :  { %2114 = vst.msk [vmem:[%s3461_s11 + $0x28] sm:$0xff] %vm1922_vm2, %v2099_v44 }

// kernel: forward.5
= control target key start
LH: loop header
LB: loop body
LE: loop exit
PB: predicated region body
PF: predicated region fallthrough
CT: control target
= control target key end

     0   :  { %v1321_v0 = vmov 0   ;;  %vm307_vm0 = vcmask 392192   ;;  %v1322_v34 = vmov 0.0   ;;  %vm1323_vm1 = vmmov 0   ;;  %s1686_s1 = inlined_call_operand.vmem [shape: bf16[432,16], index: 1, kind: input, shape index: {}]   ;;  %s1687_s0 = inlined_call_operand.vmem [shape: bf16[8,432], index: 0, kind: input, shape index: {}]   ;;  %s1688_s3 = inlined_call_operand.vmem [shape: bf16[16,64], index: 3, kind: input, shape index: {}]   ;;  %s1689_s5 = inlined_call_operand.vmem [shape: bf16[64,64], index: 5, kind: input, shape index: {}]   ;;  %s1690_s2 = inlined_call_operand.vmem [shape: f32[1,16], index: 2, kind: input, shape index: {}]   ;;  %s1691_s9 = inlined_call_operand.vmem [shape: bf16[16,16], index: 9, kind: input, shape index: {}]   ;;  %s1692_s7 = inlined_call_operand.vmem [shape: bf16[64,2], index: 7, kind: input, shape index: {}]   ;;  %s1693_s4 = inlined_call_operand.vmem [shape: f32[1,64], index: 4, kind: input, shape index: {}]   ;;  %s1694_s11 = inlined_call_operand.vmem [shape: bf16[16,32], index: 11, kind: input, shape index: {}]   ;;  %s1695_s6 = inlined_call_operand.vmem [shape: f32[1,64], index: 6, kind: input, shape index: {}]   ;;  %s1696_s10 = inlined_call_operand.vmem [shape: f32[1,16], index: 10, kind: input, shape index: {}]   ;;  %s1697_s13 = inlined_call_operand.vmem [shape: bf16[32,64], index: 13, kind: input, shape index: {}]   ;;  %s1698_s15 = inlined_call_operand.vmem [shape: bf16[64,32], index: 15, kind: input, shape index: {}]   ;;  %s1699_s12 = inlined_call_operand.vmem [shape: f32[1,32], index: 12, kind: input, shape index: {}]   ;;  %s1700_s17 = inlined_call_operand.vmem [shape: bf16[32,16], index: 17, kind: input, shape index: {}]   ;;  %s1701_s14 = inlined_call_operand.vmem [shape: f32[1,64], index: 14, kind: input, shape index: {}]   ;;  %s1702_s19 = inlined_call_operand.vmem [shape: bf16[16,6], index: 19, kind: input, shape index: {}]   ;;  %s1703_s16 = inlined_call_operand.vmem [shape: f32[1,32], index: 16, kind: input, shape index: {}]   ;;  %s1704_s18 = inlined_call_operand.vmem [shape: f32[1,16], index: 18, kind: input, shape index: {}]   ;;  %s1705_s20 = inlined_call_operand.vmem [shape: f32[1,6], index: 20, kind: input, shape index: {}]   ;;  %s1706_s8 = inlined_call_operand.vmem [shape: f32[1,2], index: 8, kind: input, shape index: {}]   ;;  %s1707_s21 = inlined_call_operand.vmem [shape: f32[8,8], index: 21, kind: output, shape index: {}]  }
   0x1   :  { %1711 = sst [smem:[#allocation2_spill]] %s1686_s1  ;;  %351 = vmatprep.subr.bf16.mxu1 %v1321_v0  ;;  %vm407_vm2 = vcmask 130048   ;;  %v1299_v53 = vld [vmem:[%s1692_s7] sm:$0xff]   ;;  %v1300_v54 = vld [vmem:[%s1692_s7 + $0x8] sm:$0xff]   ;;  %v1301_v55 = vld [vmem:[%s1692_s7 + $0x10] sm:$0xff]   ;;  %vm492_vm3 = vcmask 523264  }
   0x2   :  { %1712 = sst [smem:[#allocation3_spill]] %s1687_s0  ;;  %s1717_s26 = sld [smem:[#allocation2_spill]]  ;;  %v1092_v56 = vld [vmem:[%s1693_s4] ss:$0 sm:$0xff]  ;;  %vm766_vm4 = vcmask 261120   ;;  %vm1029_vm8 = vcmask 48128  }
   0x3   :  { %1713 = sst [smem:[#allocation4_spill]] %s1688_s3  ;;  %s1718_s28 = sld [smem:[#allocation3_spill]]  ;;  %vm1051_vm10 = vcmask 15360   ;;  %vm1053_vm11 = vcmask 64512  }
   0x4   :  { %1714 = sst [smem:[#allocation5_spill]] %s1689_s5  ;;  %s1719_s29 = sld [smem:[#allocation4_spill]] }
   0x5   :  { %1715 = sst [smem:[#allocation6_spill]] %s1690_s2  ;;  %s1721_s22 = sld [smem:[#allocation5_spill]] }
   0x6   :  { %1716 = sst [smem:[#allocation7_spill]] %s1691_s9  ;;  %s1720_s2 = sld [smem:[#allocation6_spill]] }
   0x7   :  { %s1722_s0 = sld [smem:[#allocation7_spill]] }
   0x8   :  { %v1262_v1 = vld [vmem:[%s1717_s26 + $0x80] sm:$0xff]   ;;  %v1265_v4 = vld [vmem:[%s1717_s26 + $0x88] sm:$0xff]   ;;  %v1268_v7 = vld [vmem:[%s1717_s26 + $0x90] sm:$0xff]  }
   0x9   :  { %v1263_v2 = vld [vmem:[%s1717_s26 + $0x40] sm:$0xff]   ;;  %352 = vmatpush1.bf16.msra.mxu1 %v1262_v1  ;;  %v1266_v5 = vld [vmem:[%s1717_s26 + $0x48] sm:$0xff]   ;;  %v1269_v8 = vld [vmem:[%s1717_s26 + $0x50] sm:$0xff]  }
   0xa   :  { %v1264_v3 = vld [vmem:[%s1717_s26] sm:$0xff]   ;;  %1131 = vmatprep.subr.bf16.mxu0 %v1263_v2  ;;  %353 = vmatprep.subr.bf16.mxu1 %v1321_v0  ;;  %v1267_v6 = vld [vmem:[%s1717_s26 + $0x8] sm:$0xff]   ;;  %v1270_v9 = vld [vmem:[%s1717_s26 + $0x10] sm:$0xff]  }
   0xb   :  { %1132 = vmatpush3.bf16.msra.mxu0 %v1264_v3  ;;  %v1271_v10 = vld [vmem:[%s1717_s26 + $0x98] sm:$0xff]   ;;  %v1275_v13 = vld [vmem:[%s1717_s26 + $0x60] sm:$0xff]   ;;  %v1278_v16 = vld [vmem:[%s1717_s26 + $0x68] sm:$0xff]  }
   0xc   :  { %1133 = vmatprep.subr.bf16.mxu0 %v1266_v5  ;;  %v1272_v11 = vld [vmem:[%s1717_s26 + $0x58] sm:$0xff]   ;;  %v1274_v14 = vld [vmem:[%s1717_s26 + $0xa0] sm:$0xff]   ;;  %v1277_v17 = vld [vmem:[%s1717_s26 + $0xa8] sm:$0xff]  }
   0xd   :  { %354 = vmatpush1.bf16.msra.mxu1 %v1265_v4  ;;  %v1273_v12 = vld [vmem:[%s1717_s26 + $0x18] sm:$0xff]   ;;  %v1276_v15 = vld [vmem:[%s1717_s26 + $0x20] sm:$0xff]   ;;  %v1279_v18 = vld [vmem:[%s1717_s26 + $0x28] sm:$0xff]  }
   0xe   :  { %355 = vmatprep.subr.bf16.mxu1 %v1321_v0  ;;  %v1281_v19 = vld [vmem:[%s1717_s26 + $0x70] sm:$0xff]   ;;  %v1284_v22 = vld [vmem:[%s1717_s26 + $0x78] sm:$0xff]   ;;  %v69_v23 = vld [vmem:[%s1718_s28] sm:$0xff] }
   0xf   :  { %1134 = vmatpush3.bf16.msra.mxu0 %v1267_v6  ;;  %v1280_v20 = vld [vmem:[%s1717_s26 + $0xb0] sm:$0xff]   ;;  %v1283_v24 = vld [vmem:[%s1717_s26 + $0xb8] sm:$0xff]   ;;  %v1061_v25 = vcombine.high %v69_v23, %v69_v23  ;;  %v70_v26 = vld [vmem:[%s1718_s28 + $0x8] sm:$0xff]  ;;  %v1060_v30 = vcombine.low %v69_v23, %v69_v23 }
  0x10   :  { %1135 = vmatprep.subr.bf16.mxu0 %v1269_v8  ;;  %v1282_v21 = vld [vmem:[%s1717_s26 + $0x30] sm:$0xff]   ;;  %v1285_v27 = vld [vmem:[%s1717_s26 + $0x38] sm:$0xff]   ;;  %v1063_v28 = vcombine.high %v70_v26, %v70_v26  ;;  %v1286_v29 = vld [vmem:[%s1717_s26 + $0xc0] sm:$0xff]   ;;  %v1062_v33 = vcombine.low %v70_v26, %v70_v26 }
  0x11   :  { %356 = vmatpush1.bf16.msra.mxu1 %v1268_v7  ;;  %343 = vmatprep.mubr.bf16.mxu0 %v1061_v25  ;;  %v1289_v31 = vld [vmem:[%s1717_s26 + $0xc8] sm:$0xff]   ;;  %v1290_v32 = vld [vmem:[%s1717_s26 + $0xd0] sm:$0xff]   ;;  %v1293_v35 = vld [vmem:[%s1719_s29] sm:$0xff]  }
  0x12   :  { %357 = vmatprep.subr.bf16.mxu1 %v1321_v0  ;;  %1091 = vmatprep.mubr.msk.bf16.mxu1 %vm307_vm0, %v1063_v28  ;;  %v1059_v41 = vld [vmem:[%s1720_s2] ss:$0 sm:$0xff]  ;;  %v1295_v50 = vld [vmem:[%s1721_s22 + $0x8] sm:$0xff]   ;;  %v1296_v51 = vld [vmem:[%s1721_s22 + $0x10] sm:$0xff]  }
  0x13   :  { %1136 = vmatpush3.bf16.msra.mxu0 %v1270_v9  ;;  %v1294_v47 = vld [vmem:[%s1721_s22] sm:$0xff]   ;;  %v1297_v52 = vld [vmem:[%s1721_s22 + $0x18] sm:$0xff]  }
  0x14   :  { %1137 = vmatprep.subr.bf16.mxu0 %v1272_v11  ;;  %v1298_v63 = vld [vmem:[%s1722_s0] sm:$0xff]   ;;  %v1302_v1 = vld [vmem:[%s1692_s7 + $0x18] sm:$0xff]  }
  0x15   :  { %358 = vmatpush1.bf16.msra.mxu1 %v1271_v10  ;;  %v1095_v2 = vld [vmem:[%s1695_s6] ss:$0 sm:$0xff] }
  0x16   :  { %359 = vmatprep.subr.bf16.mxu1 %v1321_v0  ;;  %v1303_v9 = vld [vmem:[%s1694_s11] sm:$0xff]  }
  0x17   :  { %1138 = vmatpush3.bf16.msra.mxu0 %v1273_v12  ;;  %v1108_v11 = vld [vmem:[%s1696_s10] ss:$0 sm:$0xff] }
  0x18   :  { %1139 = vmatprep.subr.bf16.mxu0 %v1275_v13 }
  0x19   :  { %360 = vmatpush1.bf16.msra.mxu1 %v1274_v14 }
  0x1a   :  { %361 = vmatprep.subr.bf16.mxu1 %v1321_v0 }
  0x1b   :  { %1140 = vmatpush3.bf16.msra.mxu0 %v1276_v15 }
  0x1c   :  { %1141 = vmatprep.subr.bf16.mxu0 %v1278_v16 }
  0x1d   :  { %362 = vmatpush1.bf16.msra.mxu1 %v1277_v17 }
  0x1e   :  { %363 = vmatprep.subr.bf16.mxu1 %v1321_v0 }
  0x1f   :  { %1142 = vmatpush3.bf16.msra.mxu0 %v1279_v18 }
  0x20   :  { %1143 = vmatprep.subr.bf16.mxu0 %v1281_v19  ;;  %v1304_v19 = vld [vmem:[%s1697_s13] sm:$0xff]  }
  0x21   :  { %364 = vmatpush1.bf16.msra.mxu1 %v1280_v20  ;;  %v1305_v20 = vld [vmem:[%s1697_s13 + $0x8] sm:$0xff]  }
  0x22   :  { %365 = vmatprep.subr.bf16.mxu1 %v1321_v0 }
  0x23   :  { %1144 = vmatpush3.bf16.msra.mxu0 %v1282_v21  ;;  %v1306_v21 = vld [vmem:[%s1698_s15] sm:$0xff]  }
  0x24   :  { %1145 = vmatprep.subr.bf16.mxu0 %v1284_v22  ;;  %v1307_v22 = vld [vmem:[%s1698_s15 + $0x8] sm:$0xff]  }
  0x25   :  { %366 = vmatpush1.bf16.msra.mxu1 %v1283_v24 }
  0x26   :  { %367 = vmatprep.subr.bf16.mxu1 %v1321_v0 }
  0x27   :  { %1146 = vmatpush3.bf16.msra.mxu0 %v1285_v27  ;;  %v1111_v27 = vld [vmem:[%s1699_s12] ss:$0 sm:$0xff] }
  0x28   :  { %1182 = vmatprep.subr.bf16.mxu0 %v1322_v34 }
  0x29   :  { %368 = vmatpush1.bf16.msra.mxu1 %v1286_v29 }
  0x2a   :  { %344 = vmatmul.mubr.bf16.vlgmr.msra.gmra.mrb[0].mxu0 %v1060_v30  ;;  %369 = vmatprep.subr.bf16.mxu1 %v1321_v0 }
  0x2b   :  { %1183 = vmatpush3.bf16.msra.mxu0 %v1293_v35  ;;  %1184 = vmatprep.mubr.msk.bf16.mxu0 %vm1323_vm1, %v1322_v34 }
  0x2c   :  { %1188 = vmatprep.subr.bf16.mxu0 %v1322_v34 }
  0x2d   :  { %370 = vmatpush1.bf16.msra.mxu1 %v1289_v31 }
  0x2e   :  { %371 = vmatprep.subr.bf16.mxu1 %v1321_v0 }
  0x31   :  { %372 = vmatpush1.bf16.msra.mxu1 %v1290_v32 }
  0x32   :  { %1200 = vmatprep.subr.bf16.mxu1 %v1322_v34 }
  0x34   :  { %384 = vmatmul.mubr.bf16.vlgmr.msra.gmra.mrb[0].mxu1 %v1062_v33 }
  0x35   :  { %1208 = vmatprep.mubr.msk.bf16.mxu1 %vm1323_vm1, %v1322_v34  ;;  %1201 = vmatpush3.bf16.msra.mxu1 %v1299_v53 }
  0x36   :  { %1202 = vmatprep.subr.bf16.mxu1 %v1322_v34 }
  0x39   :  { %1203 = vmatpush3.bf16.msra.mxu1 %v1300_v54 }
  0x3a   :  { %1204 = vmatprep.subr.bf16.mxu1 %v1322_v34 }
  0x3d   :  { %1205 = vmatpush3.bf16.msra.mxu1 %v1301_v55  ;;  %v1312_v55 = vld [vmem:[%s1702_s19] sm:$0xff]  }
  0x3e   :  { %1206 = vmatprep.subr.bf16.mxu1 %v1322_v34 }
  0x41   :  { %1207 = vmatpush3.bf16.msra.mxu1 %v1302_v1  ;;  %v1022_v1 = vlaneseq }
  0x42   :  { %1218 = vmatprep.subr.bf16.mxu1 %v1322_v34 }
  0xfd   :  { %v1147_v36 = vpop.f32.mrb[0].mxu0 }
  0xfe   :  { %v1148_v37 = vpop.f32.mrb[1].mxu0 }
  0xff   :  { %v1149_v38 = vadd.f32 %v1148_v37, %v1147_v36  ;;  %v1150_v39 = vpop.f32.mrb[2].mxu0  ;;  %v1308_v36 = vld [vmem:[%s1698_s15 + $0x10] sm:$0xff]   ;;  %v1309_v37 = vld [vmem:[%s1698_s15 + $0x18] sm:$0xff]  }
 0x100   :  { %v1151_v40 = vpop.f32.mrb[3].mxu0  ;;  %v1114_v39 = vld [vmem:[%s1701_s14] ss:$0 sm:$0xff] }
 0x101   :  { %v346_v42 = vadd.f32 %v1149_v38, %v1059_v41  ;;  %v1310_v38 = vld [vmem:[%s1700_s17] sm:$0xff]  }
 0x107   :  { %v385_v43 = vpop.f32.mrb[0].mxu1 }
 0x108   :  { %v386_v44 = vadd.f32 %v385_v43, %v346_v42  ;;  %v387_v45 = vpop.f32.mrb[1].mxu1 }
 0x109   :  { %v388_v46 = vpop.f32.mrb[2].mxu1 }
 0x10a   :  { %v394_v48 = vpack.c.bf16 %v386_v44, %v386_v44  ;;  %v389_v49 = vpop.f32.mrb[3].mxu1 }
 0x10c   :  { %1185 = vmatmul.mubr.msk.bf16.vlgmr.msra.gmra.mrb[4].mxu0 %vm407_vm2, %v394_v48 }
 0x10d   :  { %1189 = vmatpush3.bf16.msra.mxu0 %v1294_v47  ;;  %1196 = vmatprep.mubr.msk.bf16.mxu0 %vm1323_vm1, %v1322_v34  ;;  %v1311_v47 = vld [vmem:[%s1700_s17 + $0x8] sm:$0xff]  }
 0x10e   :  { %1190 = vmatprep.subr.bf16.mxu0 %v1322_v34 }
 0x111   :  { %1191 = vmatpush3.bf16.msra.mxu0 %v1295_v50 }
 0x112   :  { %1192 = vmatprep.subr.bf16.mxu0 %v1322_v34 }
 0x115   :  { %1193 = vmatpush3.bf16.msra.mxu0 %v1296_v51 }
 0x116   :  { %1194 = vmatprep.subr.bf16.mxu0 %v1322_v34 }
 0x119   :  { %1195 = vmatpush3.bf16.msra.mxu0 %v1297_v52 }
 0x11a   :  { %1212 = vmatprep.subr.bf16.mxu0 %v1322_v34 }
 0x1df   :  { %v445_v57 = vpop.f32.mrb[4].mxu0 }
 0x1e0   :  { %v446_v58 = vadd.f32 %v1092_v56, %v445_v57  ;;  %v1186_v59 = vpop.f32.mrb[5].mxu0  ;;  %v1124_v57 = vld [vmem:[%s1704_s18] ss:$0 sm:$0xff]  ;;  %s1324_s18 = smov 2  }
 0x1e1   :  { %v448_v60 = vpop.f32.mrb[6].mxu0 }
 0x1e2   :  { %v451_v61 = vmax.f32 %v446_v58, 0.0  ;;  %v1187_v62 = vpop.f32.mrb[7].mxu0 }
 0x1e4   :  { %v461_v0 = vpack.c.bf16 %v451_v61, %v451_v61 }
 0x1e6   :  { %1197 = vmatmul.mubr.msk.bf16.vlgmr.msra.gmra.mrb[8].mxu0 %vm492_vm3, %v461_v0 }
 0x1e7   :  { %1213 = vmatpush3.bf16.msra.mxu0 %v1298_v63  ;;  %1214 = vmatprep.mubr.msk.bf16.mxu0 %vm1323_vm1, %v1322_v34 }
 0x1e8   :  { %1224 = vmatprep.subr.bf16.mxu0 %v1322_v34 }
 0x1ee   :  { %1215 = vmatmul.mubr.msk.bf16.vlgmr.msra.gmra.mrb[12].mxu0 %vm407_vm2, %v394_v48  ;;  %v1118_v48 = vld [vmem:[%s1703_s16] ss:$0 sm:$0xff] }
 0x1ef   :  { %1228 = vmatprep.mubr.msk.bf16.mxu0 %vm1323_vm1, %v1322_v34  ;;  %1225 = vmatpush3.bf16.msra.mxu0 %v1304_v19 }
 0x1f0   :  { %1226 = vmatprep.subr.bf16.mxu0 %v1322_v34 }
 0x1f3   :  { %1227 = vmatpush3.bf16.msra.mxu0 %v1305_v20 }
 0x1f4   :  { %1244 = vmatprep.subr.bf16.mxu0 %v1322_v34 }
 0x2b9   :  { %v530_v3 = vpop.f32.mrb[8].mxu0 }
 0x2ba   :  { %v531_v4 = vadd.f32 %v1095_v2, %v530_v3  ;;  %v1198_v5 = vpop.f32.mrb[9].mxu0  ;;  %v1023_v2 = vand.u32 127, %v1022_v1  ;;  %v1128_v3 = vld [vmem:[%s1705_s20] ss:$0 sm:$0xff] }
 0x2bb   :  { %v533_v6 = vpop.f32.mrb[10].mxu0 }
 0x2bc   :  { %v536_v7 = vmax.f32 %v531_v4, 0.0  ;;  %v1199_v8 = vpop.f32.mrb[11].mxu0  ;;  %vm1036_vm5 = vcmp.ge.s32.totalorder %v1023_v2, 3  ;;  %vm1037_vm6 = vcmp.lt.s32.totalorder %v1023_v2, 6  ;;  %vm1025_vm7 = vcmp.lt.s32.totalorder %v1023_v2, 3 }
 0x2bd   :  { %vm1669_vm9 = vmand %vm1036_vm5, %vm1037_vm6 }
 0x2be   :  { %v546_v10 = vpack.c.bf16 %v536_v7, %v536_v7 }
 0x2c0   :  { %1209 = vmatmul.mubr.msk.bf16.vlgmr.msra.gmra.mrb[4].mxu1 %vm492_vm3, %v546_v10 }
 0x2c1   :  { %1219 = vmatpush3.bf16.msra.mxu1 %v1303_v9  ;;  %v675_v12 = vpop.f32.mrb[12].mxu0  ;;  %1220 = vmatprep.mubr.msk.bf16.mxu1 %vm1323_vm1, %v1322_v34 }
 0x2c2   :  { %v676_v13 = vadd.f32 %v1108_v11, %v675_v12  ;;  %v1216_v14 = vpop.f32.mrb[13].mxu0  ;;  %1232 = vmatprep.subr.bf16.mxu1 %v1322_v34 }
 0x2c3   :  { %v678_v15 = vpop.f32.mrb[14].mxu0 }
 0x2c4   :  { %v681_v16 = vmax.f32 %v676_v13, 0.0  ;;  %v1217_v17 = vpop.f32.mrb[15].mxu0 }
 0x2c6   :  { %v685_v18 = vpack.c.bf16 %v681_v16, %v681_v16 }
 0x2c8   :  { %1221 = vmatmul.mubr.msk.bf16.vlgmr.msra.gmra.mrb[8].mxu1 %vm407_vm2, %v685_v18 }
 0x2c9   :  { %1240 = vmatprep.mubr.msk.bf16.mxu1 %vm1323_vm1, %v1322_v34  ;;  %1233 = vmatpush3.bf16.msra.mxu1 %v1306_v21 }
 0x2ca   :  { %1234 = vmatprep.subr.bf16.mxu1 %v1322_v34 }
 0x2cd   :  { %1235 = vmatpush3.bf16.msra.mxu1 %v1307_v22 }
 0x2ce   :  { %1236 = vmatprep.subr.bf16.mxu1 %v1322_v34 }
 0x2d1   :  { %1237 = vmatpush3.bf16.msra.mxu1 %v1308_v36 }
 0x2d2   :  { %1238 = vmatprep.subr.bf16.mxu1 %v1322_v34 }
 0x2d5   :  { %1239 = vmatpush3.bf16.msra.mxu1 %v1309_v37 }
 0x393   :  { %v1626_v23 = vpop.f32.mrb[4].mxu1 }
 0x394   :  { %v1210_v24 = vpop.f32.mrb[5].mxu1 }
 0x395   :  { %v617_v25 = vpop.f32.mrb[6].mxu1  ;;  %v1101_v24 = vld [vmem:[%s1706_s8] ss:$0 sm:$0xff] }
 0x396   :  { %v1211_v26 = vpop.f32.mrb[7].mxu1  ;;  %v615_v25 = vadd.f32 %v1101_v24, %v1626_v23 }
 0x398   :  { %v1107_v26 = vmul.f32 -1.442695, %v615_v25 }
 0x39b   :  { %v735_v28 = vpop.f32.mrb[8].mxu1 }
 0x39c   :  { %v736_v29 = vadd.f32 %v1111_v27, %v735_v28  ;;  %v1222_v30 = vpop.f32.mrb[9].mxu1 }
 0x39d   :  { %v738_v31 = vpop.f32.mrb[10].mxu1 }
 0x39e   :  { %v741_v32 = vmax.f32 %v736_v29, 0.0  ;;  %v1223_v33 = vpop.f32.mrb[11].mxu1 }
 0x3a0   :  { %v747_v35 = vpack.c.bf16 %v741_v32, %v741_v32 }
 0x3a2   :  { %1229 = vmatmul.mubr.msk.bf16.vlgmr.msra.gmra.mrb[16].mxu0 %vm766_vm4, %v747_v35 }
 0x3a3   :  { %1248 = vmatprep.mubr.msk.bf16.mxu0 %vm1323_vm1, %v1322_v34  ;;  %1245 = vmatpush3.bf16.msra.mxu0 %v1310_v38 }
 0x3a4   :  { %1246 = vmatprep.subr.bf16.mxu0 %v1322_v34 }
 0x3a7   :  { %1247 = vmatpush3.bf16.msra.mxu0 %v1311_v47 }
 0x3a8   :  { %1252 = vmatprep.subr.bf16.mxu0 %v1322_v34 }
 0x475   :  { %v804_v40 = vpop.f32.mrb[16].mxu0 }
 0x476   :  { %v805_v41 = vadd.f32 %v1114_v39, %v804_v40  ;;  %v1230_v42 = vpop.f32.mrb[17].mxu0 }
 0x477   :  { %v807_v43 = vpop.f32.mrb[18].mxu0 }
 0x478   :  { %v810_v44 = vmax.f32 %v805_v41, 0.0  ;;  %v1231_v45 = vpop.f32.mrb[19].mxu0 }
 0x47a   :  { %v820_v46 = vpack.c.bf16 %v810_v44, %v810_v44 }
 0x47c   :  { %1241 = vmatmul.mubr.msk.bf16.vlgmr.msra.gmra.mrb[12].mxu1 %vm492_vm3, %v820_v46 }
 0x54f   :  { %v888_v49 = vpop.f32.mrb[12].mxu1 }
 0x550   :  { %v889_v50 = vadd.f32 %v1118_v48, %v888_v49  ;;  %v1242_v51 = vpop.f32.mrb[13].mxu1 }
 0x551   :  { %v891_v52 = vpop.f32.mrb[14].mxu1 }
 0x552   :  { %v894_v53 = vmax.f32 %v889_v50, 0.0  ;;  %v1243_v54 = vpop.f32.mrb[15].mxu1 }
 0x554   :  { %v900_v56 = vpack.c.bf16 %v894_v53, %v894_v53 }
 0x556   :  { %1249 = vmatmul.mubr.msk.bf16.vlgmr.msra.gmra.mrb[20].mxu0 %vm766_vm4, %v900_v56 }
 0x557   :  { %1253 = vmatpush3.bf16.msra.mxu0 %v1312_v55  ;;  %1254 = vmatprep.mubr.msk.bf16.mxu0 %vm1323_vm1, %v1322_v34 }
 0x629   :  { %v956_v58 = vpop.f32.mrb[20].mxu0 }
 0x62a   :  { %v957_v59 = vadd.f32 %v1124_v57, %v956_v58  ;;  %v1250_v60 = vpop.f32.mrb[21].mxu0 }
 0x62b   :  { %v959_v61 = vpop.f32.mrb[22].mxu0 }
 0x62c   :  { %v962_v62 = vmax.f32 %v957_v59, 0.0  ;;  %v1251_v63 = vpop.f32.mrb[23].mxu0 }
 0x62e   :  { %v966_v0 = vpack.c.bf16 %v962_v62, %v962_v62 }
 0x630   :  { %1255 = vmatmul.mubr.msk.bf16.vlgmr.msra.gmra.mrb[24].mxu0 %vm407_vm2, %v966_v0 }
 0x703   :  { %v1016_v34 = vpop.f32.mrb[24].mxu0 }
 0x704   :  { %v1017_v4 = vadd.f32 %v1128_v3, %v1016_v34  ;;  %v1256_v5 = vpop.f32.mrb[25].mxu0 }
 0x705   :  { %v1019_v6 = vpop.f32.mrb[26].mxu0 }
 0x706   :  { %v1027_v7 = vmul.f32 %v1017_v4, %v1017_v4  ;;  %v1257_v8 = vpop.f32.mrb[27].mxu0 }
 0x708   :  { %v1028_v10 = vsel %vm1025_vm7, %v1027_v7, 0.0  ;;  %v1039_v12 = vsel %vm1669_vm9, %v1027_v7, 0.0 }
 0x709   :  { %v1030_v11 = vsel %vm1029_vm8, %v1028_v10, 0.0  ;;  %v1040_v13 = vsel %vm1029_vm8, %v1039_v12, 0.0 }
 0x70a   :  { %1031 = vadd.xlane.f32.xlu0 %v1030_v11 }
 0x70e   :  { %1041 = vadd.xlane.f32.xlu0 %v1040_v13 }
 0x797   :  { %v1032_v14 = vpop.xlane.xlu0 %1031 }
 0x798   :  { %v1033_v15 = vmax.f32 %v1032_v14, 1e-24 }
 0x79a   :  { %1313 = vrsqrt.f32 %v1033_v15 }
 0x79b   :  { %v1042_v16 = vpop.xlane.xlu0 %1041 }
 0x79c   :  { %v1043_v17 = vmax.f32 %v1042_v16, 1e-24 }
 0x79e   :  { %1315 = vrsqrt.f32 %v1043_v17 }
 0x79f   :  { %1317 = vpow2.f32 %v1107_v26 }
 0x7a4   :  { %v1314_v18 = vpop.eup %1313 }
 0x7a5   :  { %v1035_v20 = vsel %vm1025_vm7, %v1314_v18, 0.0 }
 0x7a8   :  { %v1316_v19 = vpop.eup %1315 }
 0x7a9   :  { %v1045_v21 = vsel %vm1669_vm9, %v1316_v19, %v1035_v20  ;;  %v1318_v27 = vpop.eup %1317 }
 0x7aa   :  { %v1046_v22 = vmul.f32 %v1045_v21, %v1017_v4  ;;  %v623_v28 = vadd.f32 1.0, %v1318_v27 }
 0x7ac   :  { %1048 = vrot.lane.b32.xlu1 %v1046_v22, %s1324_s18  ;;  %1319 = vrcp.f32 %v623_v28 }
 0x7b6   :  { %v1320_v29 = vpop.eup %1319 }
 0x81e   :  { %v1049_v30 = vpop.permute.xlu1 %1048 }
 0x81f   :  { %v1052_v31 = vsel %vm1051_vm10, %v1320_v29, %v1049_v30 }
 0x820   :  { %1054 = vst.msk [vmem:[%s1707_s21] sm:$0xff] %vm1053_vm11, %v1052_v31 }

</bundles_post_ra>
